<compile_context>
chip_gen: v5e
topology: v5e:2x2
jax: 0.10.0
libtpu: 0.0.40
codegen_flags: <defaults>
</compile_context>

<pallas_src>
import functools

import jax
import jax.numpy as jnp
from jax.experimental import pallas as pl
from jax.experimental.pallas import tpu as pltpu


# ----------------------------------------------------------------------------- kernel
def mlp_kernel(x_ref, w1_ref, b1_ref, w2_ref, b2_ref,
               w3_ref, b3_ref, w4_ref, b4_ref, o_ref):
    mm_dtype = w1_ref.dtype                     # bf16 (or f32) MXU operand dtype

    # In-kernel cast of x (VPU work hidden under MXU/DMA); avoids a separate
    # wrapper-side XLA pass over the largest input.
    h = x_ref[...].astype(mm_dtype)

    h = jnp.dot(h, w1_ref[...], preferred_element_type=jnp.float32) + b1_ref[...]
    h = jnp.maximum(h, 0.0).astype(mm_dtype)

    h = jnp.dot(h, w2_ref[...], preferred_element_type=jnp.float32) + b2_ref[...]
    h = jnp.maximum(h, 0.0).astype(mm_dtype)

    h = jnp.dot(h, w3_ref[...], preferred_element_type=jnp.float32) + b3_ref[...]
    h = jnp.maximum(h, 0.0).astype(mm_dtype)

    out = jnp.dot(h, w4_ref[...], preferred_element_type=jnp.float32) + b4_ref[...]
    o_ref[...] = out.astype(o_ref.dtype)


# ----------------------------------------------------------------------------- helpers
def _round_up(n, m):
    return ((n + m - 1) // m) * m


def _cdiv(a, b):
    return (a + b - 1) // b


def _pad_axis(arr, axis, target):
    arr = jnp.asarray(arr)
    pad = target - arr.shape[axis]
    if pad <= 0:
        return arr
    widths = [(0, 0)] * arr.ndim
    widths[axis] = (0, pad)
    return jnp.pad(arr, widths)


def _choose_batch_tile(batch, tb_max):
    """Batch tile: multiple of 8, <= tb_max, and (when the batch allows it)
    at least ~4 grid steps so v7x's two TensorCores each get >= 2 steps."""
    tb = max(128, _round_up(_cdiv(batch, 4), 8))   # aim for ~4 steps, avoid tiny tiles
    tb = min(tb, tb_max, _round_up(batch, 8))      # never exceed the (8-aligned) batch
    return max(tb, 8)


def _vmem_budget_bytes():
    """Physical-VMEM-aware cap for vmem_limit_bytes (7/8 of capacity)."""
    try:
        info = pltpu.get_tpu_info()
        cap = getattr(info, "vmem_capacity_bytes", None)
        if cap:
            return int(cap) * 7 // 8
    except Exception:
        pass
    return 56 * 1024 * 1024        # safe on v7x (64 MiB/TC); v5e/v6e have 128 MiB


# ----------------------------------------------------------------------------- param prep (one-time)
def prepare_params(params, *, matmul_dtype=jnp.bfloat16):
    """One-time prep outside the hot path: pad narrow dims to lane width 128
    (96->128, nLatent->128) and cast matmul operands to `matmul_dtype`.

    params: [(W, b)] with W (in, out), b (out,) or (1, out).
    Returns (weights, biases, n_latent)."""
    (w1, b1), (w2, b2), (w3, b3), (w4, b4) = params

    def row(b):
        return jnp.asarray(b).reshape(1, -1)     # accept (out,) or (1, out)

    H3 = _round_up(w3.shape[1], 128)             # 96  -> 128
    NL = _round_up(w4.shape[1], 128)             # 30  -> 128
    w3p = _pad_axis(w3, 1, H3)
    b3p = _pad_axis(row(b3), 1, H3)
    w4p = _pad_axis(_pad_axis(w4, 0, H3), 1, NL)
    b4p = _pad_axis(row(b4), 1, NL)

    weights = tuple(jnp.asarray(w).astype(matmul_dtype) for w in (w1, w2, w3p, w4p))
    biases = tuple(b.astype(jnp.float32) for b in (row(b1), row(b2), b3p, b4p))
    return weights, biases, int(w4.shape[1])


# ----------------------------------------------------------------------------- forward
def met_forward(x, prepped, *, tb=1024, out_dtype=jnp.float32):
    """x: (B, nFeatures), any float dtype (cast to MXU dtype in-kernel).
    prepped: output of prepare_params()."""
    weights, biases, n_latent = prepped
    w1c, w2c, w3c, w4c = weights
    b1f, b2f, b3f, b4f = biases

    B, F = x.shape
    NL = w4c.shape[1]

    tb_eff = _choose_batch_tile(B, tb)
    grid = (_cdiv(B, tb_eff),)                   # partial trailing block is masked by Pallas

    def full_spec(arr):                          # constant block index -> VMEM resident
        return pl.BlockSpec(arr.shape, lambda i: (0, 0))

    # --- exact VMEM accounting -------------------------------------------------
    xi = jnp.dtype(x.dtype).itemsize
    oi = jnp.dtype(out_dtype).itemsize
    mm = jnp.dtype(w1c.dtype).itemsize
    wbytes = sum(int(w.size) * w.dtype.itemsize for w in weights) \
        + sum(int(b.size) * b.dtype.itemsize for b in biases)
    est_vmem = (2 * tb_eff * F * xi              # double-buffered x block
                + 2 * tb_eff * NL * oi           # double-buffered out block
                + 2 * wbytes                     # weights/biases (double-buffered worst case)
                + tb_eff * (256 + 128 + 128 + NL) * 4    # f32 activations / accumulators
                + tb_eff * (F + 256 + 128 + 128) * mm)   # bf16 copies of activations

    compiler_kwargs = dict(dimension_semantics=("parallel",))
    if est_vmem > 14 * 1024 * 1024:              # only override when the default may not fit
        compiler_kwargs["vmem_limit_bytes"] = int(
            min(est_vmem + (4 << 20), _vmem_budget_bytes()))

    out = pl.pallas_call(
        mlp_kernel,
        out_shape=jax.ShapeDtypeStruct((B, NL), out_dtype),
        grid_spec=pltpu.PrefetchScalarGridSpec(
            num_scalar_prefetch=0,
            grid=grid,
            in_specs=[
                pl.BlockSpec((tb_eff, F), lambda i: (i, 0)),
                full_spec(w1c), full_spec(b1f),
                full_spec(w2c), full_spec(b2f),
                full_spec(w3c), full_spec(b3f),
                full_spec(w4c), full_spec(b4f),
            ],
            out_specs=pl.BlockSpec((tb_eff, NL), lambda i: (i, 0)),
        ),
        compiler_params=pltpu.CompilerParams(**compiler_kwargs),
    )(x, w1c, b1f, w2c, b2f, w3c, b3f, w4c, b4f)

    # Padded lanes are exact zeros; slice to the real latent width.
    return out[:, :n_latent]


# ----------------------------------------------------------------------------- params / refs
def init_params(key, n_features=28 * 28, n_latent=30):
    """PyTorch-style uniform(-1/sqrt(fan_in), 1/sqrt(fan_in)); W stored (in, out)."""
    dims = [n_features, 256, 128, 96, n_latent]
    params = []
    for li in range(4):
        fan_in, fan_out = dims[li], dims[li + 1]
        key, kw, kb = jax.random.split(key, 3)
        bound = 1.0 / jnp.sqrt(jnp.float32(fan_in))
        W = jax.random.uniform(kw, (fan_in, fan_out), jnp.float32, -bound, bound)
        b = jax.random.uniform(kb, (1, fan_out), jnp.float32, -bound, bound)
        params.append((W, b))
    return params


def met_forward_ref_f32(x, params):
    h = x
    for i, (W, b) in enumerate(params):
        h = h @ W + b.reshape(1, -1)
        if i < len(params) - 1:
            h = jnp.maximum(h, 0.0)
    return h


def met_forward_ref_bf16(x, params):
    """Same bf16-operand / f32-accumulate recipe as the kernel, in plain JAX."""
    h = x.astype(jnp.bfloat16)
    for i, (W, b) in enumerate(params):
        h = jnp.dot(h, W.astype(jnp.bfloat16),
                    preferred_element_type=jnp.float32) + b.reshape(1, -1)
        if i < len(params) - 1:
            h = jnp.maximum(h, 0.0).astype(jnp.bfloat16)
    return h


# ----------------------------------------------------------------------------- self-test
if __name__ == "__main__":
    key = jax.random.PRNGKey(0)
    k_params, k_x = jax.random.split(key)

    n_features = 28 * 28   # 784, module default
    n_latent = 30
    batch = 64             # module's training batch size (small demo shape)

    params = init_params(k_params, n_features, n_latent)
    prepped = prepare_params(params)          # one-time weight pad + bf16 cast

    x = jax.random.normal(k_x, (batch, n_features), jnp.float32)

    fwd = functools.partial(met_forward, tb=1024)
    out = jax.block_until_ready(fwd(x, prepped))
    assert out.shape == (batch, n_latent)

    # Tight check against a pure-JAX version using the same bf16/f32 recipe.
    ref_bf16 = met_forward_ref_bf16(x, params)
    assert jnp.allclose(out, ref_bf16, atol=1e-3, rtol=1e-3), "mismatch vs bf16 reference"

    # Loose check against the full-precision reference (bf16 operand rounding).
    ref_f32 = met_forward_ref_f32(x, params)
    assert jnp.allclose(out, ref_f32, atol=2e-2, rtol=2e-2), "mismatch vs f32 reference"

    # Ragged batch (not a multiple of 8) exercises the no-pad partial-block path.
    x_ragged = x[:37]
    out_ragged = jax.block_until_ready(fwd(x_ragged, prepped))
    assert out_ragged.shape == (37, n_latent)
    assert jnp.allclose(out_ragged, ref_bf16[:37], atol=1e-3, rtol=1e-3), \
        "mismatch on ragged batch"

    print("KERNEL_OK")
</pallas_src>

<mosaic_0001>
module attributes {stable_mosaic.version = 11 : i64} {
  func.func @mlp_kernel(%arg0: i32, %arg1: memref<64x784xf32, #tpu.memory_space<vmem>>, %arg2: memref<784x256xbf16, #tpu.memory_space<vmem>>, %arg3: memref<1x256xf32, #tpu.memory_space<vmem>>, %arg4: memref<256x128xbf16, #tpu.memory_space<vmem>>, %arg5: memref<1x128xf32, #tpu.memory_space<vmem>>, %arg6: memref<128x128xbf16, #tpu.memory_space<vmem>>, %arg7: memref<1x128xf32, #tpu.memory_space<vmem>>, %arg8: memref<128x128xbf16, #tpu.memory_space<vmem>>, %arg9: memref<1x128xf32, #tpu.memory_space<vmem>>, %arg10: memref<64x128xf32, #tpu.memory_space<vmem>>) attributes {dimension_semantics = [#tpu.dimension_semantics<parallel>], iteration_bounds = array<i64: 1>, scalar_prefetch = 0 : i64, scratch_operands = 0 : i64, tpu.core_type = #tpu.core_type<tc>, window_params = [{transform_indices = @transform_0, window_bounds = array<i64: 64, 784>}, {pipeline_mode = #tpu.pipeline_mode<synchronous>, transform_indices = @transform_1, window_bounds = array<i64: 784, 256>}, {pipeline_mode = #tpu.pipeline_mode<synchronous>, transform_indices = @transform_2, window_bounds = array<i64: 1, 256>}, {pipeline_mode = #tpu.pipeline_mode<synchronous>, transform_indices = @transform_3, window_bounds = array<i64: 256, 128>}, {pipeline_mode = #tpu.pipeline_mode<synchronous>, transform_indices = @transform_4, window_bounds = array<i64: 1, 128>}, {pipeline_mode = #tpu.pipeline_mode<synchronous>, transform_indices = @transform_5, window_bounds = array<i64: 128, 128>}, {pipeline_mode = #tpu.pipeline_mode<synchronous>, transform_indices = @transform_6, window_bounds = array<i64: 1, 128>}, {pipeline_mode = #tpu.pipeline_mode<synchronous>, transform_indices = @transform_7, window_bounds = array<i64: 128, 128>}, {pipeline_mode = #tpu.pipeline_mode<synchronous>, transform_indices = @transform_8, window_bounds = array<i64: 1, 128>}, {transform_indices = @transform_9, window_bounds = array<i64: 64, 128>}]} {
    %c0 = arith.constant 0 : index
    %c0_0 = arith.constant 0 : index
    %0 = vector.load %arg1[%c0, %c0_0] : memref<64x784xf32, #tpu.memory_space<vmem>>, vector<64x784xf32>
    %1 = arith.truncf %0 : vector<64x784xf32> to vector<64x784xbf16>
    %c0_1 = arith.constant 0 : index
    %c0_2 = arith.constant 0 : index
    %2 = vector.load %arg2[%c0_1, %c0_2] : memref<784x256xbf16, #tpu.memory_space<vmem>>, vector<784x256xbf16>
    %cst = arith.constant dense<0.000000e+00> : vector<64x256xf32>
    %3 = tpu.matmul %1, %2, %cst {dimension_numbers = #tpu.dot_dimension_numbers<[1], [0], [0], [1], [0, 0, 1, 1], [], []>} : vector<64x784xbf16>, vector<784x256xbf16>, vector<64x256xf32> -> vector<64x256xf32>
    %c0_3 = arith.constant 0 : index
    %c0_4 = arith.constant 0 : index
    %4 = vector.load %arg3[%c0_3, %c0_4] : memref<1x256xf32, #tpu.memory_space<vmem>>, vector<1x256xf32>
    %5 = vector.broadcast %4 : vector<1x256xf32> to vector<64x256xf32>
    %6 = arith.addf %3, %5 : vector<64x256xf32>
    %cst_5 = arith.constant 0.000000e+00 : f32
    %7 = vector.broadcast %cst_5 : f32 to vector<64x256xf32>
    %8 = arith.maximumf %6, %7 : vector<64x256xf32>
    %9 = arith.truncf %8 : vector<64x256xf32> to vector<64x256xbf16>
    %c0_6 = arith.constant 0 : index
    %c0_7 = arith.constant 0 : index
    %10 = vector.load %arg4[%c0_6, %c0_7] : memref<256x128xbf16, #tpu.memory_space<vmem>>, vector<256x128xbf16>
    %cst_8 = arith.constant dense<0.000000e+00> : vector<64x128xf32>
    %11 = tpu.matmul %9, %10, %cst_8 {dimension_numbers = #tpu.dot_dimension_numbers<[1], [0], [0], [1], [0, 0, 1, 1], [], []>} : vector<64x256xbf16>, vector<256x128xbf16>, vector<64x128xf32> -> vector<64x128xf32>
    %c0_9 = arith.constant 0 : index
    %c0_10 = arith.constant 0 : index
    %12 = vector.load %arg5[%c0_9, %c0_10] : memref<1x128xf32, #tpu.memory_space<vmem>>, vector<1x128xf32>
    %13 = vector.broadcast %12 : vector<1x128xf32> to vector<64x128xf32>
    %14 = arith.addf %11, %13 : vector<64x128xf32>
    %cst_11 = arith.constant 0.000000e+00 : f32
    %15 = vector.broadcast %cst_11 : f32 to vector<64x128xf32>
    %16 = arith.maximumf %14, %15 : vector<64x128xf32>
    %17 = arith.truncf %16 : vector<64x128xf32> to vector<64x128xbf16>
    %c0_12 = arith.constant 0 : index
    %c0_13 = arith.constant 0 : index
    %18 = vector.load %arg6[%c0_12, %c0_13] : memref<128x128xbf16, #tpu.memory_space<vmem>>, vector<128x128xbf16>
    %cst_14 = arith.constant dense<0.000000e+00> : vector<64x128xf32>
    %19 = tpu.matmul %17, %18, %cst_14 {dimension_numbers = #tpu.dot_dimension_numbers<[1], [0], [0], [1], [0, 0, 1, 1], [], []>} : vector<64x128xbf16>, vector<128x128xbf16>, vector<64x128xf32> -> vector<64x128xf32>
    %c0_15 = arith.constant 0 : index
    %c0_16 = arith.constant 0 : index
    %20 = vector.load %arg7[%c0_15, %c0_16] : memref<1x128xf32, #tpu.memory_space<vmem>>, vector<1x128xf32>
    %21 = vector.broadcast %20 : vector<1x128xf32> to vector<64x128xf32>
    %22 = arith.addf %19, %21 : vector<64x128xf32>
    %cst_17 = arith.constant 0.000000e+00 : f32
    %23 = vector.broadcast %cst_17 : f32 to vector<64x128xf32>
    %24 = arith.maximumf %22, %23 : vector<64x128xf32>
    %25 = arith.truncf %24 : vector<64x128xf32> to vector<64x128xbf16>
    %c0_18 = arith.constant 0 : index
    %c0_19 = arith.constant 0 : index
    %26 = vector.load %arg8[%c0_18, %c0_19] : memref<128x128xbf16, #tpu.memory_space<vmem>>, vector<128x128xbf16>
    %cst_20 = arith.constant dense<0.000000e+00> : vector<64x128xf32>
    %27 = tpu.matmul %25, %26, %cst_20 {dimension_numbers = #tpu.dot_dimension_numbers<[1], [0], [0], [1], [0, 0, 1, 1], [], []>} : vector<64x128xbf16>, vector<128x128xbf16>, vector<64x128xf32> -> vector<64x128xf32>
    %c0_21 = arith.constant 0 : index
    %c0_22 = arith.constant 0 : index
    %28 = vector.load %arg9[%c0_21, %c0_22] : memref<1x128xf32, #tpu.memory_space<vmem>>, vector<1x128xf32>
    %29 = vector.broadcast %28 : vector<1x128xf32> to vector<64x128xf32>
    %30 = arith.addf %27, %29 : vector<64x128xf32>
    %c0_23 = arith.constant 0 : index
    %c0_24 = arith.constant 0 : index
    %31 = vector.load %arg10[%c0_23, %c0_24] : memref<64x128xf32, #tpu.memory_space<vmem>>, vector<64x128xf32>
    tpu.vector_store %arg10[%c0_23, %c0_24], %30 {strides = array<i32>} : memref<64x128xf32, #tpu.memory_space<vmem>>, vector<64x128xf32>,
    return
  }
  func.func @transform_0(%arg0: i32) -> (i32, i32) {
    %c0_i32 = arith.constant 0 : i32
    %c0_i32_0 = arith.constant 0 : i32
    return %arg0, %c0_i32 : i32, i32
  }
  func.func @transform_1(%arg0: i32) -> (i32, i32) {
    %c0_i32 = arith.constant 0 : i32
    %c0_i32_0 = arith.constant 0 : i32
    %c0_i32_1 = arith.constant 0 : i32
    return %c0_i32, %c0_i32_0 : i32, i32
  }
  func.func @transform_2(%arg0: i32) -> (i32, i32) {
    %c0_i32 = arith.constant 0 : i32
    %c0_i32_0 = arith.constant 0 : i32
    %c0_i32_1 = arith.constant 0 : i32
    return %c0_i32, %c0_i32_0 : i32, i32
  }
  func.func @transform_3(%arg0: i32) -> (i32, i32) {
    %c0_i32 = arith.constant 0 : i32
    %c0_i32_0 = arith.constant 0 : i32
    %c0_i32_1 = arith.constant 0 : i32
    return %c0_i32, %c0_i32_0 : i32, i32
  }
  func.func @transform_4(%arg0: i32) -> (i32, i32) {
    %c0_i32 = arith.constant 0 : i32
    %c0_i32_0 = arith.constant 0 : i32
    %c0_i32_1 = arith.constant 0 : i32
    return %c0_i32, %c0_i32_0 : i32, i32
  }
  func.func @transform_5(%arg0: i32) -> (i32, i32) {
    %c0_i32 = arith.constant 0 : i32
    %c0_i32_0 = arith.constant 0 : i32
    %c0_i32_1 = arith.constant 0 : i32
    return %c0_i32, %c0_i32_0 : i32, i32
  }
  func.func @transform_6(%arg0: i32) -> (i32, i32) {
    %c0_i32 = arith.constant 0 : i32
    %c0_i32_0 = arith.constant 0 : i32
    %c0_i32_1 = arith.constant 0 : i32
    return %c0_i32, %c0_i32_0 : i32, i32
  }
  func.func @transform_7(%arg0: i32) -> (i32, i32) {
    %c0_i32 = arith.constant 0 : i32
    %c0_i32_0 = arith.constant 0 : i32
    %c0_i32_1 = arith.constant 0 : i32
    return %c0_i32, %c0_i32_0 : i32, i32
  }
  func.func @transform_8(%arg0: i32) -> (i32, i32) {
    %c0_i32 = arith.constant 0 : i32
    %c0_i32_0 = arith.constant 0 : i32
    %c0_i32_1 = arith.constant 0 : i32
    return %c0_i32, %c0_i32_0 : i32, i32
  }
  func.func @transform_9(%arg0: i32) -> (i32, i32) {
    %c0_i32 = arith.constant 0 : i32
    %c0_i32_0 = arith.constant 0 : i32
    return %arg0, %c0_i32 : i32, i32
  }
}

</mosaic_0001>

<bundles_post_ra>
// kernel: tpu_custom_call.1
= control target key start
LH: loop header
LB: loop body
LE: loop exit
PB: predicated region body
PF: predicated region fallthrough
CT: control target
= control target key end

     0   :  { %14 = vsyncpa [#allocation3], 0  ;;  %s2921_s0 = inlined_call_operand.hbm [shape: f32[64,784], index: 0, kind: input, shape index: {}]   ;;  %s2922_s1 = inlined_call_operand.hbm [shape: bf16[784,256], index: 1, kind: input, shape index: {}]   ;;  %s2923_s2 = inlined_call_operand.hbm [shape: f32[1,256], index: 2, kind: input, shape index: {}]   ;;  %s2924_s3 = inlined_call_operand.hbm [shape: bf16[256,128], index: 3, kind: input, shape index: {}]   ;;  %s2925_s4 = inlined_call_operand.vmem [shape: f32[1,128], index: 4, kind: input, shape index: {}]   ;;  %s2926_s5 = inlined_call_operand.hbm [shape: bf16[128,128], index: 5, kind: input, shape index: {}]   ;;  %s2927_s6 = inlined_call_operand.vmem [shape: f32[1,128], index: 6, kind: input, shape index: {}]   ;;  %s2928_s7 = inlined_call_operand.hbm [shape: bf16[128,128], index: 7, kind: input, shape index: {}]   ;;  %s2929_s8 = inlined_call_operand.vmem [shape: f32[1,128], index: 8, kind: input, shape index: {}]   ;;  %s2930_s9 = inlined_call_operand.hbm [shape: f32[64,128], index: 9, kind: output, shape index: {}]  }
   0x1   :  { %15 = vsyncpa [#allocation6], 0 }
   0x2   :  { %16 = vsyncpa [#allocation9], 0 }
   0x3   :  { %17 = vsyncpa [#allocation12], 0  ;;  %s36_s11 = sshll.u32 %s2922_s1, 4  ;;  %s37_s11 = int_to_ptr.hbm [resolvable:$true] %s36_s11 }
   0x4   :  { %18 = vsyncpa [#allocation4], 0  ;;  %s2553_s12 = smov [#allocation5]   ;;  %s60_s16 = sshll.u32 %s2924_s3, 4  ;;  %s61_s16 = int_to_ptr.hbm [resolvable:$true] %s60_s16 }
   0x5   :  { %s38_s13 = sshll.u32 %s2553_s12, 4  ;;  %s2554_s17 = smov 128   ;;  %s39_s13 = int_to_ptr.vmem [resolvable:$true] %s38_s13 }
   0x6   :  { %s2555_s18 = smov 8   ;;  %s2556_s19 = smov [#allocation8]  }
   0x7   :  { %44 = dma.hbm_to_vmem [thread:$0]  %s37_s11, 12544, %s39_s13, [#allocation6], %s2554_s17, %s2554_s17, %s2555_s18  }
   0x8   :  { %s62_s20 = sshll.u32 %s2556_s19, 4  ;;  %s2557_s1 = smov 64   ;;  %s63_s20 = int_to_ptr.vmem [resolvable:$true] %s62_s20 }
   0x9   :  { %s2558_s21 = smov 4   ;;  %s23_s3 = sshll.u32 %s2921_s0, 4  ;;  %s24_s3 = int_to_ptr.hbm [resolvable:$true] %s23_s3 }
   0xa   :  { %68 = dma.hbm_to_vmem [thread:$0]  %s61_s16, 2048, %s63_s20, [#allocation9], %s2557_s1, %s2557_s1, %s2558_s21  }
   0xb   :  { %s2559_s24 = smov [#allocation2]   ;;  %s50_s28 = sshll.u32 %s2923_s2, 4  ;;  %s51_s28 = int_to_ptr.hbm [resolvable:$true] %s50_s28 }
   0xc   :  { %s25_s25 = sshll.u32 %s2559_s24, 4  ;;  %s2560_s29 = smov 896   ;;  %s26_s25 = int_to_ptr.vmem [resolvable:$true] %s25_s25 }
   0xd   :  { %s2561_s30 = smov 56   ;;  %s2562_s10 = smov [#allocation7]  }
   0xe   :  { %31 = dma.hbm_to_vmem [thread:$0]  %s24_s3, 7168, %s26_s25, [#allocation3], %s2560_s29, %s2560_s29, %s2561_s30  }
   0xf   :  { %s52_s11 = sshll.u32 %s2562_s10, 4  ;;  %s75_s14 = sshll.u32 %s2926_s5, 4  ;;  %s53_s11 = int_to_ptr.vmem [resolvable:$true] %s52_s11  ;;  %s76_s14 = int_to_ptr.hbm [resolvable:$true] %s75_s14 }
  0x10   :  { %55 = dma.hbm_to_vmem [thread:$0]  %s51_s28, 32, %s53_s11, [#allocation6]  }
  0x11   :  { %s90_s16 = sshll.u32 %s2928_s7, 4  ;;  %s2563_s19 = smov [#allocation10]   ;;  %s91_s16 = int_to_ptr.hbm [resolvable:$true] %s90_s16 }
  0x12   :  { %s77_s20 = sshll.u32 %s2563_s19, 4  ;;  %s2564_s2 = smov [#allocation11]   ;;  %s78_s20 = int_to_ptr.vmem [resolvable:$true] %s77_s20 }
  0x13   :  { %83 = dma.hbm_to_vmem [thread:$0]  %s76_s14, 1024, %s78_s20, [#allocation9], %s2557_s1, %s2557_s1, %s2558_s21  }
  0x14   :  { %s92_s22 = sshll.u32 %s2564_s2, 4  ;;  %s93_s22 = int_to_ptr.vmem [resolvable:$true] %s92_s22 }
  0x15   :  { %98 = dma.hbm_to_vmem [thread:$0]  %s91_s16, 1024, %s93_s22, [#allocation12], %s2557_s1, %s2557_s1, %s2558_s21  }
  0x16   :  { %2543 = dma.done.wait [#allocation3], 7168  }
  0x17   :  { %2544 = vsyncadd [#allocation3], 4294960128 }
  0x18   :  { %2545 = dma.done.wait [#allocation6], 12576  }
  0x19   :  { %2546 = vsyncadd [#allocation6], 4294954720 }
  0x1a   :  { %2547 = dma.done.wait [#allocation9], 3072  }
  0x1b   :  { %2548 = vsyncadd [#allocation9], 4294964224 }
  0x1c   :  { %2549 = dma.done.wait [#allocation12], 1024  }
  0x1d   :  { %2550 = vsyncadd [#allocation12], 4294966272  ;;  %v1743_v0 = vld [vmem:[#allocation5 + $0x70] sm:$0xf]  ;;  %v2228_v1 = vld [vmem:[#allocation5 + $0x74] sm:$0xf0] }
  0x1e   :  { %v1807_v2 = vld [vmem:[#allocation5 + $0xf0] sm:$0xf]  ;;  %v1744_v3 = vor.u32 %v2228_v1, %v1743_v0  ;;  %v2244_v4 = vld [vmem:[#allocation5 + $0xf4] sm:$0xf0]  ;;  %v1735_v5 = vld [vmem:[#allocation5 + $0x60] sm:$0xf] }
  0x1f   :  { %v2226_v6 = vld [vmem:[#allocation5 + $0x64] sm:$0xf0]  ;;  %v1808_v7 = vor.u32 %v2244_v4, %v1807_v2  ;;  %v1799_v8 = vld [vmem:[#allocation5 + $0xe0] sm:$0xf]  ;;  %v1727_v12 = vld [vmem:[#allocation5 + $0x50] sm:$0xf] }
  0x20   :  { %v2242_v9 = vld [vmem:[#allocation5 + $0xe4] sm:$0xf0]  ;;  %2343 = vmatpush.bf16.msra.mxu2 %v1744_v3  ;;  %817 = vmatpush.bf16.msra.mxu0 %v1744_v3  ;;  %v1736_v10 = vor.u32 %v2226_v6, %v1735_v5  ;;  %v2224_v13 = vld [vmem:[#allocation5 + $0x54] sm:$0xf0]  ;;  %v1791_v14 = vld [vmem:[#allocation5 + $0xd0] sm:$0xf] }
  0x21   :  { %2351 = vmatpush.bf16.msra.mxu3 %v1808_v7  ;;  %846 = vmatpush.bf16.msra.mxu1 %v1808_v7  ;;  %v1800_v11 = vor.u32 %v2242_v9, %v1799_v8  ;;  %v2240_v15 = vld [vmem:[#allocation5 + $0xd4] sm:$0xf0]  ;;  %v1728_v16 = vor.u32 %v2224_v13, %v1727_v12  ;;  %v1719_v18 = vld [vmem:[#allocation5 + $0x40] sm:$0xf]  ;;  %v2222_v19 = vld [vmem:[#allocation5 + $0x44] sm:$0xf0] }
  0x22   :  { %v1792_v17 = vor.u32 %v2240_v15, %v1791_v14  ;;  %v1783_v20 = vld [vmem:[#allocation5 + $0xc0] sm:$0xf]  ;;  %v2238_v21 = vld [vmem:[#allocation5 + $0xc4] sm:$0xf0]  ;;  %v1720_v22 = vor.u32 %v2222_v19, %v1719_v18  ;;  %v1711_v24 = vld [vmem:[#allocation5 + $0x30] sm:$0xf] }
  0x23   :  { %v1784_v23 = vor.u32 %v2238_v21, %v1783_v20  ;;  %v2220_v25 = vld [vmem:[#allocation5 + $0x34] sm:$0xf0]  ;;  %v1775_v26 = vld [vmem:[#allocation5 + $0xb0] sm:$0xf]  ;;  %v1703_v30 = vld [vmem:[#allocation5 + $0x20] sm:$0xf] }
  0x24   :  { %2344 = vmatpush.bf16.msra.mxu2 %v1736_v10  ;;  %818 = vmatpush.bf16.msra.mxu0 %v1736_v10  ;;  %v2236_v27 = vld [vmem:[#allocation5 + $0xb4] sm:$0xf0]  ;;  %v1712_v28 = vor.u32 %v2220_v25, %v1711_v24  ;;  %v2218_v31 = vld [vmem:[#allocation5 + $0x24] sm:$0xf0]  ;;  %v1767_v32 = vld [vmem:[#allocation5 + $0xa0] sm:$0xf] }
  0x25   :  { %2352 = vmatpush.bf16.msra.mxu3 %v1800_v11  ;;  %847 = vmatpush.bf16.msra.mxu1 %v1800_v11  ;;  %v1776_v29 = vor.u32 %v2236_v27, %v1775_v26  ;;  %v2234_v33 = vld [vmem:[#allocation5 + $0xa4] sm:$0xf0]  ;;  %v1704_v34 = vor.u32 %v2218_v31, %v1703_v30  ;;  %v1695_v36 = vld [vmem:[#allocation5 + $0x10] sm:$0xf]  ;;  %v2216_v37 = vld [vmem:[#allocation5 + $0x14] sm:$0xf0] }
  0x26   :  { %v1768_v35 = vor.u32 %v2234_v33, %v1767_v32  ;;  %v1759_v38 = vld [vmem:[#allocation5 + $0x90] sm:$0xf]  ;;  %v2232_v39 = vld [vmem:[#allocation5 + $0x94] sm:$0xf0]  ;;  %v1696_v40 = vor.u32 %v2216_v37, %v1695_v36  ;;  %v1687_v41 = vld [vmem:[#allocation5] sm:$0xf] }
  0x27   :  { %v1760_v42 = vor.u32 %v2232_v39, %v1759_v38  ;;  %v2214_v43 = vld [vmem:[#allocation5 + $0x4] sm:$0xf0]  ;;  %v1751_v44 = vld [vmem:[#allocation5 + $0x80] sm:$0xf]  ;;  %v161_v47 = vld [vmem:[#allocation2 + $0x118] sm:$0xff]  ;;  %vm804_vm0 = vcmask 130048  }
  0x28   :  { %2345 = vmatpush.bf16.msra.mxu2 %v1728_v16  ;;  %819 = vmatpush.bf16.msra.mxu0 %v1728_v16  ;;  %v2230_v45 = vld [vmem:[#allocation5 + $0x84] sm:$0xf0]  ;;  %v154_v46 = vld [vmem:[#allocation2 + $0xe0] sm:$0xff]  ;;  %v1871_v48 = vld [vmem:[#allocation5 + $0x170] sm:$0xf]  ;;  %v1688_v54 = vor.u32 %v2214_v43, %v1687_v41  ;;  %s1669_s25 = sshll.u32 %s2930_s9, 4  ;;  %s1670_s25 = int_to_ptr.hbm [resolvable:$true] %s1669_s25 }
  0x29   :  { %2353 = vmatpush.bf16.msra.mxu3 %v1792_v17  ;;  %848 = vmatpush.bf16.msra.mxu1 %v1792_v17  ;;  %v2260_v49 = vld [vmem:[#allocation5 + $0x174] sm:$0xf0]  ;;  %v155_v50 = vld [vmem:[#allocation2 + $0xe8] sm:$0xff]  ;;  %v162_v51 = vld [vmem:[#allocation2 + $0x120] sm:$0xff]  ;;  %v1752_v58 = vor.u32 %v2230_v45, %v1751_v44  ;;  %v2646_v3 = vpack.c.bf16 %v161_v47, %v154_v46 }
  0x2a   :  { %v1935_v52 = vld [vmem:[#allocation5 + $0x1f0] sm:$0xf]  ;;  %v2276_v53 = vld [vmem:[#allocation5 + $0x1f4] sm:$0xf0]  ;;  %v126_v55 = vld [vmem:[#allocation2] sm:$0xff]  ;;  %v1872_v59 = vor.u32 %v2260_v49, %v1871_v48  ;;  %v2650_v8 = vpack.c.bf16 %v162_v51, %v155_v50 }
  0x2b   :  { %v133_v56 = vld [vmem:[#allocation2 + $0x38] sm:$0xff]  ;;  %v1999_v57 = vld [vmem:[#allocation5 + $0x270] sm:$0xf]  ;;  %v127_v61 = vld [vmem:[#allocation2 + $0x8] sm:$0xff]  ;;  %v1936_v63 = vor.u32 %v2276_v53, %v1935_v52 }
  0x2c   :  { %2346 = vmatpush.bf16.msra.mxu2 %v1720_v22  ;;  %820 = vmatpush.bf16.msra.mxu0 %v1720_v22  ;;  %v2292_v60 = vld [vmem:[#allocation5 + $0x274] sm:$0xf0]  ;;  %v134_v62 = vld [vmem:[#allocation2 + $0x40] sm:$0xff]  ;;  %v2258_v1 = vld [vmem:[#allocation5 + $0x164] sm:$0xf0]  ;;  %v2648_v4 = vpack.c.bf16 %v133_v56, %v126_v55 }
  0x2d   :  { %2354 = vmatpush.bf16.msra.mxu3 %v1784_v23  ;;  %849 = vmatpush.bf16.msra.mxu1 %v1784_v23  ;;  %v1863_v0 = vld [vmem:[#allocation5 + $0x160] sm:$0xf]  ;;  %v2274_v5 = vld [vmem:[#allocation5 + $0x1e4] sm:$0xf0]  ;;  %v2063_v6 = vld [vmem:[#allocation5 + $0x2f0] sm:$0xf]  ;;  %v2000_v9 = vor.u32 %v2292_v60, %v1999_v57  ;;  %v2652_v10 = vpack.c.bf16 %v134_v62, %v127_v61 }
  0x2e   :  { %v1927_v2 = vld [vmem:[#allocation5 + $0x1e0] sm:$0xf]  ;;  %v2308_v7 = vld [vmem:[#allocation5 + $0x2f4] sm:$0xf0]  ;;  %v1864_v11 = vor.u32 %v2258_v1, %v1863_v0  ;;  %v2290_v13 = vld [vmem:[#allocation5 + $0x264] sm:$0xf0] }
  0x2f   :  { %v1991_v12 = vld [vmem:[#allocation5 + $0x260] sm:$0xf]  ;;  %v1928_v14 = vor.u32 %v2274_v5, %v1927_v2  ;;  %v2064_v15 = vor.u32 %v2308_v7, %v2063_v6  ;;  %v1855_v16 = vld [vmem:[#allocation5 + $0x150] sm:$0xf]  ;;  %v2256_v17 = vld [vmem:[#allocation5 + $0x154] sm:$0xf0] }
  0x30   :  { %2347 = vmatpush.bf16.msra.mxu2 %v1712_v28  ;;  %821 = vmatpush.bf16.msra.mxu0 %v1712_v28  ;;  %v1919_v18 = vld [vmem:[#allocation5 + $0x1d0] sm:$0xf]  ;;  %v2272_v19 = vld [vmem:[#allocation5 + $0x1d4] sm:$0xf0]  ;;  %v2055_v20 = vld [vmem:[#allocation5 + $0x2e0] sm:$0xf]  ;;  %v1992_v22 = vor.u32 %v2290_v13, %v1991_v12  ;;  %v1856_v23 = vor.u32 %v2256_v17, %v1855_v16 }
  0x31   :  { %2355 = vmatpush.bf16.msra.mxu3 %v1776_v29  ;;  %850 = vmatpush.bf16.msra.mxu1 %v1776_v29  ;;  %v2306_v21 = vld [vmem:[#allocation5 + $0x2e4] sm:$0xf0]  ;;  %v1983_v24 = vld [vmem:[#allocation5 + $0x250] sm:$0xf]  ;;  %v2288_v25 = vld [vmem:[#allocation5 + $0x254] sm:$0xf0]  ;;  %v1920_v26 = vor.u32 %v2272_v19, %v1919_v18 }
  0x32   :  { %v2056_v27 = vor.u32 %v2306_v21, %v2055_v20  ;;  %v1847_v28 = vld [vmem:[#allocation5 + $0x140] sm:$0xf]  ;;  %v2254_v29 = vld [vmem:[#allocation5 + $0x144] sm:$0xf0]  ;;  %v2047_v32 = vld [vmem:[#allocation5 + $0x2d0] sm:$0xf] }
  0x33   :  { %v1911_v30 = vld [vmem:[#allocation5 + $0x1c0] sm:$0xf]  ;;  %v2270_v31 = vld [vmem:[#allocation5 + $0x1c4] sm:$0xf0]  ;;  %v2304_v33 = vld [vmem:[#allocation5 + $0x2d4] sm:$0xf0]  ;;  %v1848_v37 = vor.u32 %v2254_v29, %v1847_v28 }
  0x34   :  { %2348 = vmatpush.bf16.msra.mxu2 %v1704_v34  ;;  %822 = vmatpush.bf16.msra.mxu0 %v1704_v34  ;;  %v1984_v34 = vor.u32 %v2288_v25, %v1983_v24  ;;  %v2286_v36 = vld [vmem:[#allocation5 + $0x244] sm:$0xf0]  ;;  %v1839_v38 = vld [vmem:[#allocation5 + $0x130] sm:$0xf]  ;;  %v2252_v39 = vld [vmem:[#allocation5 + $0x134] sm:$0xf0]  ;;  %v1912_v41 = vor.u32 %v2270_v31, %v1911_v30 }
  0x35   :  { %2356 = vmatpush.bf16.msra.mxu3 %v1768_v35  ;;  %851 = vmatpush.bf16.msra.mxu1 %v1768_v35  ;;  %v1975_v35 = vld [vmem:[#allocation5 + $0x240] sm:$0xf]  ;;  %v168_v43 = vld [vmem:[#allocation2 + $0x150] sm:$0xff]  ;;  %v175_v44 = vld [vmem:[#allocation2 + $0x188] sm:$0xff]  ;;  %v1840_v57 = vor.u32 %v2252_v39, %v1839_v38 }
  0x36   :  { %v2268_v45 = vld [vmem:[#allocation5 + $0x1b4] sm:$0xf0]  ;;  %v2039_v46 = vld [vmem:[#allocation5 + $0x2c0] sm:$0xf]  ;;  %v2302_v47 = vld [vmem:[#allocation5 + $0x2c4] sm:$0xf0]  ;;  %v1976_v53 = vor.u32 %v2286_v36, %v1975_v35 }
  0x37   :  { %v169_v48 = vld [vmem:[#allocation2 + $0x158] sm:$0xff]  ;;  %v176_v49 = vld [vmem:[#allocation2 + $0x190] sm:$0xff]  ;;  %v147_v51 = vld [vmem:[#allocation2 + $0xa8] sm:$0xff] }
  0x38   :  { %2349 = vmatpush.bf16.msra.mxu2 %v1696_v40  ;;  %823 = vmatpush.bf16.msra.mxu0 %v1696_v40  ;;  %v1903_v40 = vld [vmem:[#allocation5 + $0x1b0] sm:$0xf]  ;;  %v141_v55 = vld [vmem:[#allocation2 + $0x78] sm:$0xff]  ;;  %v1831_v60 = vld [vmem:[#allocation5 + $0x120] sm:$0xf]  ;;  %v2662_v6 = vpack.c.bf16 %v176_v49, %v169_v48 }
  0x39   :  { %2357 = vmatpush.bf16.msra.mxu3 %v1760_v42  ;;  %852 = vmatpush.bf16.msra.mxu1 %v1760_v42  ;;  %v2048_v42 = vor.u32 %v2304_v33, %v2047_v32  ;;  %v140_v50 = vld [vmem:[#allocation2 + $0x70] sm:$0xff]  ;;  %v2250_v61 = vld [vmem:[#allocation5 + $0x124] sm:$0xf0]  ;;  %v1895_v62 = vld [vmem:[#allocation5 + $0x1a0] sm:$0xf] }
  0x3a   :  { %v1967_v52 = vld [vmem:[#allocation5 + $0x230] sm:$0xf]  ;;  %v2660_v0 = vpack.c.bf16 %v147_v51, %v140_v50  ;;  %v2266_v1 = vld [vmem:[#allocation5 + $0x1a4] sm:$0xf0]  ;;  %v2300_v5 = vld [vmem:[#allocation5 + $0x2b4] sm:$0xf0] }
  0x3b   :  { %v148_v56 = vld [vmem:[#allocation2 + $0xb0] sm:$0xff]  ;;  %v1959_v12 = vld [vmem:[#allocation5 + $0x220] sm:$0xf]  ;;  %v2282_v13 = vld [vmem:[#allocation5 + $0x224] sm:$0xf0] }
  0x3c   :  { %2350 = vmatpush.bf16.msra.mxu2 %v1688_v54  ;;  %824 = vmatpush.bf16.msra.mxu0 %v1688_v54  ;;  %v2284_v54 = vld [vmem:[#allocation5 + $0x234] sm:$0xf0]  ;;  %v2031_v2 = vld [vmem:[#allocation5 + $0x2b0] sm:$0xf]  ;;  %v2023_v20 = vld [vmem:[#allocation5 + $0x2a0] sm:$0xf] }
  0x3d   :  { %2358 = vmatpush.bf16.msra.mxu3 %v1752_v58  ;;  %853 = vmatpush.bf16.msra.mxu1 %v1752_v58  ;;  %v1904_v58 = vor.u32 %v2268_v45, %v1903_v40  ;;  %v1968_v7 = vor.u32 %v2284_v54, %v1967_v52  ;;  %v1823_v16 = vld [vmem:[#allocation5 + $0x110] sm:$0xf]  ;;  %v2248_v17 = vld [vmem:[#allocation5 + $0x114] sm:$0xf0]  ;;  %v2298_v21 = vld [vmem:[#allocation5 + $0x2a4] sm:$0xf0] }
  0x3e   :  { %v1887_v18 = vld [vmem:[#allocation5 + $0x190] sm:$0xf]  ;;  %v2264_v19 = vld [vmem:[#allocation5 + $0x194] sm:$0xf0]  ;;  %v2024_v28 = vor.u32 %v2298_v21, %v2023_v20  ;;  %v2246_v29 = vld [vmem:[#allocation5 + $0x104] sm:$0xf0] }
  0x3f   :  { %835 = vmatmul.bf16.vlgmr.msra.gmra.mxu2 %v2646_v3  ;;  %825 = vmatmul.bf16.vlgmr.msra.gmra.mxu0 %v2648_v4  ;;  %v1951_v24 = vld [vmem:[#allocation5 + $0x210] sm:$0xf]  ;;  %v2280_v25 = vld [vmem:[#allocation5 + $0x214] sm:$0xf0]  ;;  %v1879_v30 = vld [vmem:[#allocation5 + $0x180] sm:$0xf] }
  0x40   :  { %875 = vmatpush.bf16.msrb.mxu2 %v1872_v59  ;;  %864 = vmatmul.bf16.vlgmr.msra.gmra.mxu3 %v2650_v8  ;;  %v2040_v59 = vor.u32 %v2302_v47, %v2039_v46  ;;  %v2262_v31 = vld [vmem:[#allocation5 + $0x184] sm:$0xf0]  ;;  %v2015_v32 = vld [vmem:[#allocation5 + $0x290] sm:$0xf]  ;;  %v2296_v33 = vld [vmem:[#allocation5 + $0x294] sm:$0xf0]  ;;  %v1952_v35 = vor.u32 %v2280_v25, %v1951_v24 }
  0x41   :  { %904 = vmatpush.bf16.msrb.mxu3 %v1936_v63  ;;  %933 = vmatpush.bf16.msrb.mxu0 %v2000_v9  ;;  %v2658_v63 = vpack.c.bf16 %v175_v44, %v168_v43  ;;  %v2664_v9 = vpack.c.bf16 %v148_v56, %v141_v55  ;;  %v2310_v36 = vld [vmem:[#allocation5 + $0x304] sm:$0xf0]  ;;  %v1745_v38 = vld [vmem:[#allocation5 + $0x78] sm:$0xf0]  ;;  %v1943_v40 = vld [vmem:[#allocation5 + $0x200] sm:$0xf]  ;;  %v2016_v43 = vor.u32 %v2296_v33, %v2015_v32 }
  0x42   :  { %854 = vmatmul.bf16.vlgmr.msra.gmra.mxu1 %v2652_v10  ;;  %v128_v44 = vld [vmem:[#allocation2 + $0x10] sm:$0xff]  ;;  %v135_v45 = vld [vmem:[#allocation2 + $0x48] sm:$0xff]  ;;  %v1809_v47 = vld [vmem:[#allocation5 + $0xf8] sm:$0xf0] }
  0x43   :  { %962 = vmatpush.bf16.msrb.mxu1 %v2064_v15  ;;  %v2032_v15 = vor.u32 %v2300_v5, %v2031_v2  ;;  %v2243_v46 = vld [vmem:[#allocation5 + $0xf4] sm:$0xf]  ;;  %v129_v48 = vld [vmem:[#allocation2 + $0x18] sm:$0xff]  ;;  %v2007_v50 = vld [vmem:[#allocation5 + $0x280] sm:$0xf]  ;;  %v2670_v5 = vpack.c.bf16 %v135_v45, %v128_v44 }
  0x44   :  { %876 = vmatpush.bf16.msrb.mxu2 %v1864_v11  ;;  %v1832_v11 = vor.u32 %v2250_v61, %v1831_v60  ;;  %v2294_v51 = vld [vmem:[#allocation5 + $0x284] sm:$0xf0]  ;;  %v136_v54 = vld [vmem:[#allocation2 + $0x50] sm:$0xff]  ;;  %v130_v55 = vld [vmem:[#allocation2 + $0x20] sm:$0xff] }
  0x45   :  { %905 = vmatpush.bf16.msrb.mxu3 %v1928_v14  ;;  %934 = vmatpush.bf16.msrb.mxu0 %v1992_v22  ;;  %v1896_v14 = vor.u32 %v2266_v1, %v1895_v62  ;;  %v1960_v22 = vor.u32 %v2282_v13, %v1959_v12  ;;  %v137_v56 = vld [vmem:[#allocation2 + $0x58] sm:$0xff]  ;;  %v2008_v61 = vor.u32 %v2294_v51, %v2007_v50  ;;  %v138_v62 = vld [vmem:[#allocation2 + $0x60] sm:$0xff]  ;;  %v1737_v2 = vld [vmem:[#allocation5 + $0x68] sm:$0xf0] }
  0x46   :  { %v1873_v60 = vld [vmem:[#allocation5 + $0x178] sm:$0xf0]  ;;  %v2225_v1 = vld [vmem:[#allocation5 + $0x64] sm:$0xf]  ;;  %v1801_v12 = vld [vmem:[#allocation5 + $0xe8] sm:$0xf0]  ;;  %v2674_v13 = vpack.c.bf16 %v136_v54, %v129_v48 }
  0x47   :  { %963 = vmatpush.bf16.msrb.mxu1 %v2056_v27  ;;  %v1888_v27 = vor.u32 %v2264_v19, %v1887_v18  ;;  %v1865_v18 = vld [vmem:[#allocation5 + $0x168] sm:$0xf0]  ;;  %v2223_v19 = vld [vmem:[#allocation5 + $0x54] sm:$0xf]  ;;  %v1729_v20 = vld [vmem:[#allocation5 + $0x58] sm:$0xf0] }
  0x48   :  { %877 = vmatpush.bf16.msrb.mxu2 %v1856_v23  ;;  %v1824_v23 = vor.u32 %v2248_v17, %v1823_v16  ;;  %v1740_v16 = vor.u32 %v2225_v1, %v1737_v2  ;;  %v2257_v17 = vld [vmem:[#allocation5 + $0x164] sm:$0xf]  ;;  %v1732_v25 = vor.u32 %v2223_v19, %v1729_v20  ;;  %v1785_v32 = vld [vmem:[#allocation5 + $0xc8] sm:$0xf0]  ;;  %v1777_v44 = vld [vmem:[#allocation5 + $0xb8] sm:$0xf0] }
  0x49   :  { %906 = vmatpush.bf16.msrb.mxu3 %v1920_v26  ;;  %935 = vmatpush.bf16.msrb.mxu0 %v1984_v34  ;;  %v1815_v26 = vld [vmem:[#allocation5 + $0x100] sm:$0xf]  ;;  %v1868_v24 = vor.u32 %v2257_v17, %v1865_v18  ;;  %v2251_v51 = vld [vmem:[#allocation5 + $0x134] sm:$0xf]  ;;  %v2217_v54 = vld [vmem:[#allocation5 + $0x24] sm:$0xf] }
  0x4a   :  { %v2071_v34 = vld [vmem:[#allocation5 + $0x300] sm:$0xf]  ;;  %v1816_v39 = vor.u32 %v2246_v29, %v1815_v26  ;;  %v2255_v26 = vld [vmem:[#allocation5 + $0x154] sm:$0xf]  ;;  %v1721_v29 = vld [vmem:[#allocation5 + $0x48] sm:$0xf0] }
  0x4b   :  { %964 = vmatpush.bf16.msrb.mxu1 %v2048_v42  ;;  %v1880_v42 = vor.u32 %v2262_v31, %v1879_v30  ;;  %v2072_v49 = vor.u32 %v2310_v36, %v2071_v34  ;;  %v2237_v31 = vld [vmem:[#allocation5 + $0xc4] sm:$0xf]  ;;  %v1849_v36 = vld [vmem:[#allocation5 + $0x148] sm:$0xf0]  ;;  %v2215_v1 = vld [vmem:[#allocation5 + $0x14] sm:$0xf] }
  0x4c   :  { %878 = vmatpush.bf16.msrb.mxu2 %v1848_v37  ;;  %v2227_v37 = vld [vmem:[#allocation5 + $0x74] sm:$0xf]  ;;  %v150_v45 = vld [vmem:[#allocation2 + $0xc0] sm:$0xff]  ;;  %v1697_v2 = vld [vmem:[#allocation5 + $0x18] sm:$0xf0] }
  0x4d   :  { %907 = vmatpush.bf16.msrb.mxu3 %v1912_v41  ;;  %936 = vmatpush.bf16.msrb.mxu0 %v1976_v53  ;;  %v2278_v41 = vld [vmem:[#allocation5 + $0x204] sm:$0xf0]  ;;  %v1748_v52 = vor.u32 %v2227_v37, %v1745_v38  ;;  %v142_v37 = vld [vmem:[#allocation2 + $0x80] sm:$0xff]  ;;  %v149_v38 = vld [vmem:[#allocation2 + $0xb8] sm:$0xff] }
  0x4e   :  { %v1944_v53 = vor.u32 %v2278_v41, %v1943_v40  ;;  %v1713_v40 = vld [vmem:[#allocation5 + $0x38] sm:$0xf0]  ;;  %v1788_v41 = vor.u32 %v2237_v31, %v1785_v32  ;;  %v2249_v17 = vld [vmem:[#allocation5 + $0x124] sm:$0xf]  ;;  %v1833_v18 = vld [vmem:[#allocation5 + $0x128] sm:$0xf0] }
  0x4f   :  { %965 = vmatpush.bf16.msrb.mxu1 %v2040_v59  ;;  %840 = vmatmul.bf16.gmra.mxu2 %v2658_v63  ;;  %v2259_v59 = vld [vmem:[#allocation5 + $0x174] sm:$0xf]  ;;  %v2213_v19 = vld [vmem:[#allocation5 + $0x4] sm:$0xf]  ;;  %v1836_v20 = vor.u32 %v2249_v17, %v1833_v18  ;;  %v163_v32 = vld [vmem:[#allocation2 + $0x128] sm:$0xff] }
  0x50   :  { %879 = vmatpush.bf16.msrb.mxu2 %v1840_v57  ;;  %830 = vmatmul.bf16.gmra.mxu0 %v2660_v0  ;;  %v131_v57 = vld [vmem:[#allocation2 + $0x28] sm:$0xff]  ;;  %v156_v31 = vld [vmem:[#allocation2 + $0xf0] sm:$0xff]  ;;  %v170_v17 = vld [vmem:[#allocation2 + $0x160] sm:$0xff] }
  0x51   :  { %908 = vmatpush.bf16.msrb.mxu3 %v1904_v58  ;;  %937 = vmatpush.bf16.msrb.mxu0 %v1968_v7  ;;  %v1812_v58 = vor.u32 %v2243_v46, %v1809_v47  ;;  %v2672_v7 = vpack.c.bf16 %v137_v56, %v130_v55  ;;  %v144_v46 = vld [vmem:[#allocation2 + $0x90] sm:$0xff]  ;;  %v151_v47 = vld [vmem:[#allocation2 + $0xc8] sm:$0xff]  ;;  %v177_v18 = vld [vmem:[#allocation2 + $0x198] sm:$0xff] }
  0x52   :  { %869 = vmatmul.bf16.gmra.mxu3 %v2662_v6  ;;  %859 = vmatmul.bf16.gmra.mxu1 %v2664_v9  ;;  %v1705_v55 = vld [vmem:[#allocation5 + $0x28] sm:$0xf0] }
  0x53   :  { %966 = vmatpush.bf16.msrb.mxu1 %v2032_v15  ;;  %v2676_v15 = vpack.c.bf16 %v138_v62, %v131_v57  ;;  %v2682_v57 = vpack.c.bf16 %v149_v38, %v142_v37  ;;  %v1708_v62 = vor.u32 %v2217_v54, %v1705_v55  ;;  %v164_v37 = vld [vmem:[#allocation2 + $0x130] sm:$0xff]  ;;  %v159_v38 = vld [vmem:[#allocation2 + $0x108] sm:$0xff]  ;;  %v2289_v55 = vld [vmem:[#allocation5 + $0x264] sm:$0xf] }
  0x54   :  { %880 = vmatpush.bf16.msrb.mxu2 %v1832_v11  ;;  %v2241_v11 = vld [vmem:[#allocation5 + $0xe4] sm:$0xf] }
  0x55   :  { %909 = vmatpush.bf16.msrb.mxu3 %v1896_v14  ;;  %938 = vmatpush.bf16.msrb.mxu0 %v1960_v22  ;;  %v1876_v14 = vor.u32 %v2259_v59, %v1873_v60  ;;  %v1804_v21 = vor.u32 %v2241_v11, %v1801_v12  ;;  %v2239_v22 = vld [vmem:[#allocation5 + $0xd4] sm:$0xf]  ;;  %v2233_v11 = vld [vmem:[#allocation5 + $0xa4] sm:$0xf]  ;;  %v1700_v12 = vor.u32 %v2215_v1, %v1697_v2  ;;  %v2065_v1 = vld [vmem:[#allocation5 + $0x2f8] sm:$0xf0] }
  0x56   :  { %v2309_v2 = vld [vmem:[#allocation5 + $0x304] sm:$0xf] }
  0x57   :  { %967 = vmatpush.bf16.msrb.mxu1 %v2024_v28  ;;  %v2221_v28 = vld [vmem:[#allocation5 + $0x44] sm:$0xf] }
  0x58   :  { %881 = vmatpush.bf16.msrb.mxu2 %v1824_v23  ;;  %v1793_v23 = vld [vmem:[#allocation5 + $0xd8] sm:$0xf0]  ;;  %v1724_v34 = vor.u32 %v2221_v28, %v1721_v29  ;;  %v2229_v29 = vld [vmem:[#allocation5 + $0x84] sm:$0xf] }
  0x59   :  { %910 = vmatpush.bf16.msrb.mxu3 %v1888_v27  ;;  %939 = vmatpush.bf16.msrb.mxu0 %v1952_v35  ;;  %v1857_v27 = vld [vmem:[#allocation5 + $0x158] sm:$0xf0]  ;;  %v1796_v30 = vor.u32 %v2239_v22, %v1793_v23  ;;  %v2253_v35 = vld [vmem:[#allocation5 + $0x144] sm:$0xf]  ;;  %v2231_v22 = vld [vmem:[#allocation5 + $0x94] sm:$0xf] }
  0x5a   :  { %v1860_v33 = vor.u32 %v2255_v26, %v1857_v27  ;;  %v1852_v48 = vor.u32 %v2253_v35, %v1849_v36  ;;  %v1761_v23 = vld [vmem:[#allocation5 + $0x98] sm:$0xf0] }
  0x5b   :  { %968 = vmatpush.bf16.msrb.mxu1 %v2016_v43  ;;  %v2235_v43 = vld [vmem:[#allocation5 + $0xb4] sm:$0xf]  ;;  %v1825_v26 = vld [vmem:[#allocation5 + $0x118] sm:$0xf0] }
  0x5c   :  { %882 = vmatpush.bf16.msrb.mxu2 %v1816_v39  ;;  %v2219_v39 = vld [vmem:[#allocation5 + $0x34] sm:$0xf]  ;;  %v1780_v56 = vor.u32 %v2235_v43, %v1777_v44  ;;  %v157_v36 = vld [vmem:[#allocation2 + $0xf8] sm:$0xff]  ;;  %v2245_v44 = vld [vmem:[#allocation5 + $0x104] sm:$0xf] }
  0x5d   :  { %911 = vmatpush.bf16.msrb.mxu3 %v1880_v42  ;;  %940 = vmatpush.bf16.msrb.mxu0 %v1944_v53  ;;  %v143_v42 = vld [vmem:[#allocation2 + $0x88] sm:$0xff]  ;;  %v1716_v50 = vor.u32 %v2219_v39, %v1713_v40  ;;  %v152_v53 = vld [vmem:[#allocation2 + $0xd0] sm:$0xff]  ;;  %v166_v39 = vld [vmem:[#allocation2 + $0x140] sm:$0xff]  ;;  %v2694_v40 = vpack.c.bf16 %v163_v32, %v156_v31 }
  0x5e   :  { %v2686_v59 = vpack.c.bf16 %v150_v45, %v143_v42  ;;  %v2698_v42 = vpack.c.bf16 %v164_v37, %v157_v36  ;;  %v2700_v43 = vpack.c.bf16 %v166_v39, %v159_v38  ;;  %v1817_v45 = vld [vmem:[#allocation5 + $0x108] sm:$0xf0]  ;;  %v2287_v31 = vld [vmem:[#allocation5 + $0x254] sm:$0xf]  ;;  %v2269_v38 = vld [vmem:[#allocation5 + $0x1c4] sm:$0xf] }
  0x5f   :  { %969 = vmatpush.bf16.msrb.mxu1 %v2008_v61  ;;  %883 = vmatmul.bf16.vlgmr.msrb.gmra.mxu2 %v2670_v5  ;;  %v1913_v39 = vld [vmem:[#allocation5 + $0x1c8] sm:$0xf0] }
  0x60   :  { %998 = vmatpush.bf16.msra.mxu2 %v2072_v49  ;;  %941 = vmatmul.bf16.vlgmr.msrb.gmra.mxu0 %v2672_v7  ;;  %v145_v49 = vld [vmem:[#allocation2 + $0x98] sm:$0xff] }
  0x61   :  { %1020 = vmatpush.bf16.msra.mxu3 %v1748_v52  ;;  %1049 = vmatpush.bf16.msra.mxu0 %v1812_v58  ;;  %v1841_v52 = vld [vmem:[#allocation5 + $0x138] sm:$0xf0]  ;;  %v2684_v58 = vpack.c.bf16 %v151_v47, %v144_v46  ;;  %v2688_v61 = vpack.c.bf16 %v152_v53, %v145_v49  ;;  %v1820_v46 = vor.u32 %v2245_v44, %v1817_v45  ;;  %v2275_v47 = vld [vmem:[#allocation5 + $0x1f4] sm:$0xf]  ;;  %v1929_v53 = vld [vmem:[#allocation5 + $0x1e8] sm:$0xf0] }
  0x62   :  { %912 = vmatmul.bf16.vlgmr.msrb.gmra.mxu3 %v2674_v13  ;;  %970 = vmatmul.bf16.vlgmr.msrb.gmra.mxu1 %v2676_v15  ;;  %v1844_v60 = vor.u32 %v2251_v51, %v1841_v52  ;;  %v2291_v49 = vld [vmem:[#allocation5 + $0x274] sm:$0xf]  ;;  %v2001_v51 = vld [vmem:[#allocation5 + $0x278] sm:$0xf0]  ;;  %v2273_v52 = vld [vmem:[#allocation5 + $0x1e4] sm:$0xf]  ;;  %v1916_v45 = vor.u32 %v2269_v38, %v1913_v39 }
  0x63   :  { %1078 = vmatpush.bf16.msra.mxu1 %v1876_v14  ;;  %v1769_v14 = vld [vmem:[#allocation5 + $0xa8] sm:$0xf0]  ;;  %v2004_v54 = vor.u32 %v2291_v49, %v2001_v51  ;;  %v2285_v44 = vld [vmem:[#allocation5 + $0x244] sm:$0xf]  ;;  %v132_v51 = vld [vmem:[#allocation2 + $0x30] sm:$0xff] }
  0x64   :  { %v1881_v38 = vld [vmem:[#allocation5 + $0x188] sm:$0xf0]  ;;  %v2732_v39 = vld [vmem:[#allocation7] sm:$0x3] }
  0x65   :  { %1021 = vmatpush.bf16.msra.mxu3 %v1740_v16  ;;  %1050 = vmatpush.bf16.msra.mxu0 %v1804_v21  ;;  %v1772_v16 = vor.u32 %v2233_v11, %v1769_v14  ;;  %v1689_v21 = vld [vmem:[#allocation5 + $0x8] sm:$0xf0] }
  0x66   :  { %v1692_v27 = vor.u32 %v2213_v19, %v1689_v21  ;;  %v2073_v11 = vld [vmem:[#allocation5 + $0x308] sm:$0xf0]  ;;  %v172_v19 = vld [vmem:[#allocation2 + $0x170] sm:$0xff] }
  0x67   :  { %1079 = vmatpush.bf16.msra.mxu1 %v1868_v24  ;;  %v1764_v24 = vor.u32 %v2231_v22, %v1761_v23  ;;  %v171_v21 = vld [vmem:[#allocation2 + $0x168] sm:$0xff]  ;;  %v178_v22 = vld [vmem:[#allocation2 + $0x1a0] sm:$0xff]  ;;  %v173_v23 = vld [vmem:[#allocation2 + $0x178] sm:$0xff] }
  0x69   :  { %1022 = vmatpush.bf16.msra.mxu3 %v1732_v25  ;;  %1051 = vmatpush.bf16.msra.mxu0 %v1796_v30  ;;  %v2247_v25 = vld [vmem:[#allocation5 + $0x114] sm:$0xf]  ;;  %v1753_v30 = vld [vmem:[#allocation5 + $0x88] sm:$0xf0] }
  0x6a   :  { %v1828_v28 = vor.u32 %v2247_v25, %v1825_v26  ;;  %v1756_v35 = vor.u32 %v2229_v29, %v1753_v30  ;;  %v2706_v25 = vpack.c.bf16 %v177_v18, %v170_v17  ;;  %v2271_v29 = vld [vmem:[#allocation5 + $0x1d4] sm:$0xf]  ;;  %v1921_v30 = vld [vmem:[#allocation5 + $0x1d8] sm:$0xf0]  ;;  %v1961_v18 = vld [vmem:[#allocation5 + $0x228] sm:$0xf0] }
  0x6b   :  { %1080 = vmatpush.bf16.msra.mxu1 %v1860_v33  ;;  %v158_v33 = vld [vmem:[#allocation2 + $0x100] sm:$0xff]  ;;  %v1924_v32 = vor.u32 %v2271_v29, %v1921_v30  ;;  %v1889_v29 = vld [vmem:[#allocation5 + $0x198] sm:$0xf0]  ;;  %v2279_v30 = vld [vmem:[#allocation5 + $0x214] sm:$0xf] }
  0x6d   :  { %1023 = vmatpush.bf16.msra.mxu3 %v1724_v34  ;;  %1052 = vmatpush.bf16.msra.mxu0 %v1788_v41  ;;  %v165_v34 = vld [vmem:[#allocation2 + $0x138] sm:$0xff] }
  0x6e   :  { %v2696_v41 = vpack.c.bf16 %v165_v34, %v158_v33  ;;  %v1985_v33 = vld [vmem:[#allocation5 + $0x258] sm:$0xf0]  ;;  %v2305_v34 = vld [vmem:[#allocation5 + $0x2e4] sm:$0xf] }
  0x6f   :  { %1081 = vmatpush.bf16.msra.mxu1 %v1852_v48  ;;  %888 = vmatmul.bf16.gmra.mxu2 %v2682_v57  ;;  %v1937_v48 = vld [vmem:[#allocation5 + $0x1f8] sm:$0xf0]  ;;  %v1988_v36 = vor.u32 %v2287_v31, %v1985_v33  ;;  %v2297_v33 = vld [vmem:[#allocation5 + $0x2a4] sm:$0xf] }
  0x70   :  { %946 = vmatmul.bf16.gmra.mxu0 %v2684_v58 }
  0x71   :  { %1024 = vmatpush.bf16.msra.mxu3 %v1716_v50  ;;  %1053 = vmatpush.bf16.msra.mxu0 %v1780_v56  ;;  %v1940_v50 = vor.u32 %v2275_v47, %v1937_v48  ;;  %v1993_v56 = vld [vmem:[#allocation5 + $0x268] sm:$0xf0]  ;;  %v2303_v47 = vld [vmem:[#allocation5 + $0x2d4] sm:$0xf]  ;;  %v2049_v48 = vld [vmem:[#allocation5 + $0x2d8] sm:$0xf0] }
  0x72   :  { %917 = vmatmul.bf16.gmra.mxu3 %v2686_v59  ;;  %975 = vmatmul.bf16.gmra.mxu1 %v2688_v61 }
  0x73   :  { %1082 = vmatpush.bf16.msra.mxu1 %v1844_v60  ;;  %v2307_v60 = vld [vmem:[#allocation5 + $0x2f4] sm:$0xf]  ;;  %1107 = vmatpush.bf16.msrb.mxu2 %v1940_v50  ;;  %v2052_v50 = vor.u32 %v2303_v47, %v2049_v48  ;;  %v167_v47 = vld [vmem:[#allocation2 + $0x148] sm:$0xff]  ;;  %v2017_v48 = vld [vmem:[#allocation5 + $0x298] sm:$0xf0] }
  0x74   :  { %v2068_v14 = vor.u32 %v2307_v60, %v2065_v1  ;;  %v2301_v1 = vld [vmem:[#allocation5 + $0x2c4] sm:$0xf] }
  0x75   :  { %1025 = vmatpush.bf16.msra.mxu3 %v1708_v62  ;;  %1054 = vmatpush.bf16.msra.mxu0 %v1772_v16  ;;  %v1932_v62 = vor.u32 %v2273_v52, %v1929_v53  ;;  %v2076_v16 = vor.u32 %v2309_v2, %v2073_v11  ;;  %v139_v52 = vld [vmem:[#allocation2 + $0x68] sm:$0xff] }
  0x76   :  { %v2718_v53 = vpack.c.bf16 %v139_v52, %v132_v51  ;;  %v2041_v2 = vld [vmem:[#allocation5 + $0x2c8] sm:$0xf0] }
  0x77   :  { %1083 = vmatpush.bf16.msra.mxu1 %v1836_v20  ;;  %1108 = vmatpush.bf16.msrb.mxu2 %v1932_v62  ;;  %v179_v20 = vld [vmem:[#allocation2 + $0x1a8] sm:$0xff]  ;;  %v1969_v62 = vld [vmem:[#allocation5 + $0x238] sm:$0xf0] }
  0x78   :  { %v2708_v26 = vpack.c.bf16 %v179_v20, %v172_v19  ;;  %v146_v19 = vld [vmem:[#allocation2 + $0xa0] sm:$0xff]  ;;  %v153_v20 = vld [vmem:[#allocation2 + $0xd8] sm:$0xff] }
  0x79   :  { %1026 = vmatpush.bf16.msra.mxu3 %v1700_v12  ;;  %1055 = vmatpush.bf16.msra.mxu0 %v1764_v24  ;;  %v1996_v12 = vor.u32 %v2289_v55, %v1993_v56  ;;  %v180_v24 = vld [vmem:[#allocation2 + $0x1b0] sm:$0xff]  ;;  %v1905_v55 = vld [vmem:[#allocation5 + $0x1b8] sm:$0xf0] }
  0x7a   :  { %v2283_v56 = vld [vmem:[#allocation5 + $0x234] sm:$0xf] }
  0x7b   :  { %1084 = vmatpush.bf16.msra.mxu1 %v1828_v28  ;;  %v2712_v28 = vpack.c.bf16 %v180_v24, %v173_v23  ;;  %1109 = vmatpush.bf16.msrb.mxu2 %v1924_v32  ;;  %v1972_v11 = vor.u32 %v2283_v56, %v1969_v62  ;;  %v2725_v23 = vpack.c.bf16 %v153_v20, %v146_v19  ;;  %v2263_v24 = vld [vmem:[#allocation5 + $0x194] sm:$0xf]  ;;  %v1953_v32 = vld [vmem:[#allocation5 + $0x218] sm:$0xf0] }
  0x7c   :  { %v1892_v31 = vor.u32 %v2263_v24, %v1889_v29  ;;  %v181_v19 = vld [vmem:[#allocation2 + $0x1b8] sm:$0xff] }
  0x7d   :  { %1027 = vmatpush.bf16.msra.mxu3 %v1692_v27  ;;  %1056 = vmatpush.bf16.msra.mxu0 %v1756_v35  ;;  %v2710_v27 = vpack.c.bf16 %v178_v22, %v171_v21  ;;  %v2057_v35 = vld [vmem:[#allocation5 + $0x2e8] sm:$0xf0] }
  0x7e   :  { %v2060_v37 = vor.u32 %v2305_v34, %v2057_v35  ;;  %v2025_v34 = vld [vmem:[#allocation5 + $0x2a8] sm:$0xf0]  ;;  %v1956_v35 = vor.u32 %v2279_v30, %v1953_v32 }
  0x7f   :  { %893 = vmatmul.bf16.gmra.mxu2 %v2694_v40  ;;  %1085 = vmatpush.bf16.msra.mxu1 %v1820_v46  ;;  %v1977_v46 = vld [vmem:[#allocation5 + $0x248] sm:$0xf0] }
  0x80   :  { %951 = vmatmul.bf16.gmra.mxu0 %v2696_v41  ;;  %v1980_v49 = vor.u32 %v2285_v44, %v1977_v46  ;;  %1110 = vmatpush.bf16.msrb.mxu2 %v1916_v45  ;;  %v1945_v44 = vld [vmem:[#allocation5 + $0x208] sm:$0xf0]  ;;  %v2295_v45 = vld [vmem:[#allocation5 + $0x294] sm:$0xf] }
  0x81   :  { %1136 = vmatpush.bf16.msrb.mxu3 %v2004_v54  ;;  %1165 = vmatpush.bf16.msrb.mxu0 %v2068_v14  ;;  %v2267_v54 = vld [vmem:[#allocation5 + $0x1b4] sm:$0xf]  ;;  %v2265_v14 = vld [vmem:[#allocation5 + $0x1a4] sm:$0xf] }
  0x82   :  { %922 = vmatmul.bf16.gmra.mxu3 %v2698_v42  ;;  %980 = vmatmul.bf16.gmra.mxu1 %v2700_v43  ;;  %v1908_v60 = vor.u32 %v2267_v54, %v1905_v55  ;;  %v160_v46 = vld [vmem:[#allocation2 + $0x110] sm:$0xff]  ;;  %v2293_v54 = vld [vmem:[#allocation5 + $0x284] sm:$0xf]  ;;  %v2009_v55 = vld [vmem:[#allocation5 + $0x288] sm:$0xf0] }
  0x83   :  { %1201 = vmatpush.bf16.msrb.mxu1 %v2076_v16  ;;  %v1897_v16 = vld [vmem:[#allocation5 + $0x1a8] sm:$0xf0]  ;;  %v2735_v51 = vpack.c.bf16 %v167_v47, %v160_v46 }
  0x84   :  { %1111 = vmatpush.bf16.msrb.mxu2 %v1908_v60  ;;  %v1900_v17 = vor.u32 %v2265_v14, %v1897_v16  ;;  %v2012_v60 = vor.u32 %v2293_v54, %v2009_v55 }
  0x85   :  { %1137 = vmatpush.bf16.msrb.mxu3 %v1996_v12  ;;  %1166 = vmatpush.bf16.msrb.mxu0 %v2060_v37  ;;  %v2044_v12 = vor.u32 %v2301_v1, %v2041_v2  ;;  %v2261_v37 = vld [vmem:[#allocation5 + $0x184] sm:$0xf] }
  0x88   :  { %1112 = vmatpush.bf16.msrb.mxu2 %v1900_v17 }
  0x89   :  { %1138 = vmatpush.bf16.msrb.mxu3 %v1988_v36  ;;  %1167 = vmatpush.bf16.msrb.mxu0 %v2052_v50  ;;  %v2028_v36 = vor.u32 %v2297_v33, %v2025_v34  ;;  %v310_v50 = vperm.slane %v2732_v39, 0 }
  0x8c   :  { %1113 = vmatpush.bf16.msrb.mxu2 %v1892_v31 }
  0x8d   :  { %1139 = vmatpush.bf16.msrb.mxu3 %v1980_v49  ;;  %1168 = vmatpush.bf16.msrb.mxu0 %v2044_v12  ;;  %v2020_v49 = vor.u32 %v2295_v45, %v2017_v48 }
  0x8f   :  { %898 = vmatmul.bf16.gmra.mxu2 %v2706_v25 }
  0x90   :  { %956 = vmatmul.bf16.gmra.mxu0 %v2708_v26 }
  0x91   :  { %1140 = vmatpush.bf16.msrb.mxu3 %v1972_v11 }
  0x92   :  { %927 = vmatmul.bf16.gmra.mxu3 %v2710_v27  ;;  %985 = vmatmul.bf16.gmra.mxu1 %v2712_v28 }
  0x9f   :  { %2077 = vmatmul.msk.bf16.vlgmr.msra.gmra.mxu2 %vm804_vm0, %v2718_v53 }
  0xa0   :  { %1057 = vmatmul.bf16.vlgmr.msra.gmra.mxu0 %v2652_v10  ;;  %v2281_v10 = vld [vmem:[#allocation5 + $0x224] sm:$0xf] }
  0xa1   :  { %v1964_v21 = vor.u32 %v2281_v10, %v1961_v18 }
  0xa2   :  { %1028 = vmatmul.bf16.vlgmr.msra.gmra.mxu3 %v2648_v4  ;;  %1086 = vmatmul.bf16.vlgmr.msra.gmra.mxu1 %v2670_v5  ;;  %v2299_v4 = vld [vmem:[#allocation5 + $0x2b4] sm:$0xf]  ;;  %v2033_v5 = vld [vmem:[#allocation5 + $0x2b8] sm:$0xf0] }
  0xa3   :  { %v2036_v22 = vor.u32 %v2299_v4, %v2033_v5  ;;  %1141 = vmatpush.bf16.msrb.mxu3 %v1964_v21  ;;  %v174_v4 = vld [vmem:[#allocation2 + $0x180] sm:$0xff] }
  0xa4   :  { %v2746_v5 = vpack.c.bf16 %v181_v19, %v174_v4 }
  0xa5   :  { %1169 = vmatpush.bf16.msrb.mxu0 %v2036_v22 }
  0xa7   :  { %1142 = vmatpush.bf16.msrb.mxu3 %v1956_v35 }
  0xa9   :  { %1170 = vmatpush.bf16.msrb.mxu0 %v2028_v36 }
  0xad   :  { %1171 = vmatpush.bf16.msrb.mxu0 %v2020_v49 }
  0xaf   :  { %2078 = vmatmul.msk.bf16.gmra.mxu2 %vm804_vm0, %v2725_v23 }
  0xb0   :  { %1062 = vmatmul.bf16.gmra.mxu0 %v2664_v9  ;;  %v1884_v9 = vor.u32 %v2261_v37, %v1881_v38 }
  0xb1   :  { %1172 = vmatpush.bf16.msrb.mxu0 %v2012_v60 }
  0xb2   :  { %1033 = vmatmul.bf16.gmra.mxu3 %v2660_v0  ;;  %1091 = vmatmul.bf16.gmra.mxu1 %v2682_v57  ;;  %v2277_v0 = vld [vmem:[#allocation5 + $0x204] sm:$0xf] }
  0xb3   :  { %1114 = vmatpush.bf16.msrb.mxu2 %v1884_v9  ;;  %v1948_v57 = vor.u32 %v2277_v0, %v1945_v44 }
  0xb5   :  { %1143 = vmatpush.bf16.msrb.mxu3 %v1948_v57 }
  0xbc   :  { %v826_v52 = vpop.f32.mrf.mxu0 }
  0xbd   :  { %v827_v56 = vadd.f32 %v826_v52, %v310_v50 }
  0xbf   :  { %v855_v62 = vpop.f32.mrf.mxu1  ;;  %2079 = vmatmul.msk.bf16.gmra.mxu2 %vm804_vm0, %v2735_v51 }
  0xc0   :  { %v856_v1 = vadd.f32 %v855_v62, %v827_v56  ;;  %1067 = vmatmul.bf16.gmra.mxu0 %v2650_v8 }
  0xc2   :  { %1038 = vmatmul.bf16.gmra.mxu3 %v2646_v3  ;;  %1096 = vmatmul.bf16.gmra.mxu1 %v2694_v40  ;;  %v836_v2 = vpop.f32.mrf.mxu2 }
  0xc3   :  { %v837_v11 = vadd.f32 %v836_v2, %v310_v50  ;;  %v865_v12 = vpop.f32.mrf.mxu3 }
  0xc4   :  { %v828_v14 = vpop.f32.mrf.mxu0 }
  0xc5   :  { %v2742_v16 = vadd.f32 %v865_v12, %v837_v11  ;;  %v829_v17 = vadd.f32 %v828_v14, %v310_v50  ;;  %v2315_v14 = vld [vmem:[#allocation8 + $0x20] sm:$0xff] }
  0xc7   :  { %v857_v10 = vpop.f32.mrf.mxu1 }
  0xc8   :  { %v2744_v18 = vadd.f32 %v857_v10, %v829_v17  ;;  %v2314_v10 = vld [vmem:[#allocation8 + $0x18] sm:$0xff] }
  0xca   :  { %v838_v20 = vpop.f32.mrf.mxu2 }
  0xcb   :  { %v839_v21 = vadd.f32 %v838_v20, %v310_v50  ;;  %v867_v8 = vpop.f32.mrf.mxu3 }
  0xcd   :  { %v831_v3 = vpop.f32.mrf.mxu0  ;;  %v2748_v22 = vadd.f32 %v867_v8, %v839_v21 }
  0xce   :  { %v832_v40 = vadd.f32 %v831_v3, %v310_v50  ;;  %v2313_v3 = vld [vmem:[#allocation8 + $0x10] sm:$0xff] }
  0xcf   :  { %v860_v24 = vpop.f32.mrf.mxu1  ;;  %2080 = vmatmul.msk.bf16.gmra.mxu2 %vm804_vm0, %v2746_v5 }
  0xd0   :  { %v861_v29 = vadd.f32 %v860_v24, %v832_v40  ;;  %1072 = vmatmul.bf16.gmra.mxu0 %v2662_v6 }
  0xd2   :  { %1043 = vmatmul.bf16.gmra.mxu3 %v2658_v63  ;;  %1101 = vmatmul.bf16.gmra.mxu1 %v2706_v25  ;;  %v841_v30 = vpop.f32.mrf.mxu2 }
  0xd3   :  { %v842_v31 = vadd.f32 %v841_v30, %v310_v50 }
  0xd5   :  { %v870_v32 = vpop.f32.mrf.mxu3  ;;  %v833_v33 = vpop.f32.mrf.mxu0 }
  0xd6   :  { %v2755_v34 = vadd.f32 %v870_v32, %v842_v31  ;;  %v834_v35 = vadd.f32 %v833_v33, %v310_v50 }
  0xd7   :  { %v862_v36 = vpop.f32.mrf.mxu1 }
  0xd8   :  { %v2757_v37 = vadd.f32 %v862_v36, %v834_v35 }
  0xda   :  { %v843_v38 = vpop.f32.mrf.mxu2 }
  0xdb   :  { %v844_v9 = vadd.f32 %v843_v38, %v310_v50 }
  0xdd   :  { %v872_v0 = vpop.f32.mrf.mxu3  ;;  %v942_v44 = vpop.f32.mrf.mxu0 }
  0xde   :  { %v2759_v45 = vadd.f32 %v872_v0, %v844_v9  ;;  %v2326_v9 = vld [vmem:[#allocation8 + $0x78] sm:$0xff] }
  0xdf   :  { %v971_v6 = vpop.f32.mrf.mxu1  ;;  %1115 = vmatmul.bf16.vlgmr.msrb.gmra.mxu2 %v2674_v13  ;;  %1408 = vmatpush.bf16.msra.mxu3 %v2326_v9  ;;  %v2321_v9 = vld [vmem:[#allocation8 + $0x50] sm:$0xff] }
  0xe0   :  { %1173 = vmatmul.bf16.vlgmr.msrb.gmra.mxu0 %v2676_v15 }
  0xe2   :  { %1144 = vmatmul.bf16.vlgmr.msrb.gmra.mxu3 %v2672_v7  ;;  %2081 = vmatmul.msk.bf16.vlgmr.msrb.gmra.mxu1 %vm804_vm0, %v2718_v53  ;;  %v884_v63 = vpop.f32.mrf.mxu2  ;;  %v2318_v53 = vld [vmem:[#allocation8 + $0x38] sm:$0xff] }
  0xe3   :  { %v885_v25 = vadd.f32 %v884_v63, %v856_v1  ;;  %1379 = vmatpush.bf16.msra.mxu2 %v2318_v53  ;;  %v2317_v1 = vld [vmem:[#allocation8 + $0x30] sm:$0xff]  ;;  %v2826_v63 = vperm.slane %v2732_v39, 1 }
  0xe5   :  { %v913_v46 = vpop.f32.mrf.mxu3  ;;  %v2766_v47 = vpop.f32.mrf.mxu0 }
  0xe6   :  { %v914_v57 = vadd.f32 %v913_v46, %v885_v25 }
  0xe7   :  { %v2768_v48 = vpop.f32.mrf.mxu1  ;;  %1380 = vmatpush.bf16.msra.mxu2 %v2317_v1 }
  0xe8   :  { %v943_v49 = vadd.f32 %v942_v44, %v914_v57 }
  0xea   :  { %v2770_v50 = vadd.f32 %v971_v6, %v943_v49  ;;  %v2772_v52 = vpop.f32.mrf.mxu2  ;;  %v2325_v6 = vld [vmem:[#allocation8 + $0x70] sm:$0xff] }
  0xeb   :  { %1409 = vmatpush.bf16.msra.mxu3 %v2325_v6 }
  0xed   :  { %v2774_v13 = vpop.f32.mrf.mxu3  ;;  %v947_v15 = vpop.f32.mrf.mxu0 }
  0xef   :  { %v976_v7 = vpop.f32.mrf.mxu1  ;;  %1120 = vmatmul.bf16.gmra.mxu2 %v2686_v59  ;;  %v2316_v59 = vld [vmem:[#allocation8 + $0x28] sm:$0xff] }
  0xf0   :  { %1178 = vmatmul.bf16.gmra.mxu0 %v2688_v61  ;;  %1381 = vmatpush.bf16.msra.mxu2 %v2316_v59 }
  0xf2   :  { %1149 = vmatmul.bf16.gmra.mxu3 %v2684_v58  ;;  %2082 = vmatmul.msk.bf16.gmra.mxu1 %vm804_vm0, %v2725_v23  ;;  %v889_v54 = vpop.f32.mrf.mxu2 }
  0xf3   :  { %v890_v55 = vadd.f32 %v889_v54, %v861_v29 }
  0xf4   :  { %1382 = vmatpush.bf16.msra.mxu2 %v2315_v14 }
  0xf5   :  { %v918_v56 = vpop.f32.mrf.mxu3  ;;  %v2781_v60 = vpop.f32.mrf.mxu0 }
  0xf6   :  { %v919_v62 = vadd.f32 %v918_v56, %v890_v55 }
  0xf7   :  { %v2783_v2 = vpop.f32.mrf.mxu1 }
  0xf8   :  { %v948_v11 = vadd.f32 %v947_v15, %v919_v62  ;;  %1383 = vmatpush.bf16.msra.mxu2 %v2314_v10 }
  0xfa   :  { %v2785_v61 = vadd.f32 %v976_v7, %v948_v11  ;;  %v2787_v58 = vpop.f32.mrf.mxu2 }
  0xfb   :  { %v892_v11 = vadd.f32 %v2787_v58, %v2757_v37  ;;  %v2322_v37 = vld [vmem:[#allocation8 + $0x58] sm:$0xff] }
  0xfc   :  { %1384 = vmatpush.bf16.msra.mxu2 %v2313_v3 }
  0xfd   :  { %v2789_v12 = vpop.f32.mrf.mxu3  ;;  %v952_v23 = vpop.f32.mrf.mxu0 }
  0xfe   :  { %v921_v10 = vadd.f32 %v2789_v12, %v892_v11 }
  0xff   :  { %v981_v17 = vpop.f32.mrf.mxu1  ;;  %1125 = vmatmul.bf16.gmra.mxu2 %v2698_v42 }
 0x100   :  { %1183 = vmatmul.bf16.gmra.mxu0 %v2700_v43  ;;  %v2312_v43 = vld [vmem:[#allocation8 + $0x8] sm:$0xff] }
 0x101   :  { %1385 = vmatpush.bf16.msra.mxu2 %v2312_v43 }
 0x102   :  { %1154 = vmatmul.bf16.gmra.mxu3 %v2696_v41  ;;  %2083 = vmatmul.msk.bf16.gmra.mxu1 %vm804_vm0, %v2735_v51  ;;  %v894_v4 = vpop.f32.mrf.mxu2 }
 0x103   :  { %v895_v19 = vadd.f32 %v894_v4, %v2742_v16  ;;  %v2311_v16 = vld [vmem:[#allocation8] sm:$0xff] }
 0x105   :  { %v923_v20 = vpop.f32.mrf.mxu3  ;;  %v2797_v21 = vpop.f32.mrf.mxu0  ;;  %1386 = vmatpush.bf16.msra.mxu2 %v2311_v16 }
 0x106   :  { %v924_v8 = vadd.f32 %v923_v20, %v895_v19  ;;  %v950_v20 = vadd.f32 %v2781_v60, %v921_v10 }
 0x107   :  { %v2799_v40 = vpop.f32.mrf.mxu1 }
 0x108   :  { %v953_v42 = vadd.f32 %v952_v23, %v924_v8  ;;  %v979_v12 = vadd.f32 %v2783_v2, %v950_v20 }
 0x10a   :  { %v2801_v41 = vadd.f32 %v981_v17, %v953_v42  ;;  %v2803_v24 = vpop.f32.mrf.mxu2  ;;  %v2323_v17 = vld [vmem:[#allocation8 + $0x60] sm:$0xff] }
 0x10d   :  { %v2805_v51 = vpop.f32.mrf.mxu3  ;;  %v957_v29 = vpop.f32.mrf.mxu0 }
 0x10f   :  { %v986_v30 = vpop.f32.mrf.mxu1  ;;  %1130 = vmatmul.bf16.gmra.mxu2 %v2710_v27 }
 0x110   :  { %1188 = vmatmul.bf16.gmra.mxu0 %v2712_v28 }
 0x112   :  { %1159 = vmatmul.bf16.gmra.mxu3 %v2708_v26  ;;  %2084 = vmatmul.msk.bf16.gmra.mxu1 %vm804_vm0, %v2746_v5  ;;  %v899_v31 = vpop.f32.mrf.mxu2  ;;  %v887_v5 = vadd.f32 %v2772_v52, %v2744_v18  ;;  %v2324_v18 = vld [vmem:[#allocation8 + $0x68] sm:$0xff] }
 0x113   :  { %v900_v32 = vadd.f32 %v899_v31, %v2755_v34  ;;  %1410 = vmatpush.bf16.msra.mxu3 %v2324_v18  ;;  %v897_v31 = vadd.f32 %v2803_v24, %v2748_v22 }
 0x114   :  { %v916_v25 = vadd.f32 %v2774_v13, %v887_v5 }
 0x115   :  { %v928_v33 = vpop.f32.mrf.mxu3  ;;  %v2813_v35 = vpop.f32.mrf.mxu0 }
 0x116   :  { %v929_v36 = vadd.f32 %v928_v33, %v900_v32  ;;  %v945_v7 = vadd.f32 %v2766_v47, %v916_v25 }
 0x117   :  { %v2815_v38 = vpop.f32.mrf.mxu1  ;;  %1411 = vmatpush.bf16.msra.mxu3 %v2323_v17 }
 0x118   :  { %v958_v0 = vadd.f32 %v957_v29, %v929_v36  ;;  %v974_v13 = vadd.f32 %v2768_v48, %v945_v7  ;;  %v2320_v7 = vld [vmem:[#allocation8 + $0x48] sm:$0xff] }
 0x11a   :  { %v2817_v27 = vadd.f32 %v986_v30, %v958_v0  ;;  %v2819_v28 = vpop.f32.mrf.mxu2  ;;  %v926_v0 = vadd.f32 %v2805_v51, %v897_v31 }
 0x11b   :  { %1412 = vmatpush.bf16.msra.mxu3 %v2322_v37  ;;  %v902_v18 = vadd.f32 %v2819_v28, %v2759_v45 }
 0x11d   :  { %v2821_v26 = vpop.f32.mrf.mxu3  ;;  %v1058_v44 = vpop.f32.mrf.mxu0 }
 0x11f   :  { %v1087_v34 = vpop.f32.mrf.mxu1  ;;  %1413 = vmatpush.bf16.msra.mxu3 %v2321_v9 }
 0x122   :  { %v1000_v46 = vpop.f32.mrf.mxu2 }
 0x123   :  { %v1001_v39 = vadd.f32 %v1000_v46, %v2770_v50  ;;  %1414 = vmatpush.bf16.msra.mxu3 %v2320_v7 }
 0x125   :  { %v1029_v57 = vpop.f32.mrf.mxu3  ;;  %v2830_v15 = vpop.f32.mrf.mxu0  ;;  %v1223_v47 = vmax.f32 %v1001_v39, 0.0 }
 0x126   :  { %v1030_v49 = vadd.f32 %v1029_v57, %v2826_v63 }
 0x127   :  { %v2833_v54 = vpop.f32.mrf.mxu1 }
 0x128   :  { %v1059_v53 = vadd.f32 %v1058_v44, %v1030_v49 }
 0x12a   :  { %v2835_v52 = vadd.f32 %v1087_v34, %v1059_v53  ;;  %v1002_v55 = vpop.f32.mrf.mxu2  ;;  %v955_v34 = vadd.f32 %v2797_v21, %v926_v0 }
 0x12b   :  { %v1003_v56 = vadd.f32 %v1002_v55, %v974_v13 }
 0x12c   :  { %v984_v46 = vadd.f32 %v2799_v40, %v955_v34  ;;  %v2319_v40 = vld [vmem:[#allocation8 + $0x40] sm:$0xff] }
 0x12d   :  { %v2839_v62 = vpop.f32.mrf.mxu3  ;;  %v1063_v1 = vpop.f32.mrf.mxu0  ;;  %v1225_v59 = vmax.f32 %v1003_v56, 0.0  ;;  %v931_v56 = vadd.f32 %v2821_v26, %v902_v18  ;;  %1415 = vmatpush.bf16.msra.mxu3 %v2319_v40 }
 0x12f   :  { %v1092_v23 = vpop.f32.mrf.mxu1  ;;  %v1239_v14 = vpack.c.bf16 %v1225_v59, %v1223_v47  ;;  %v960_v59 = vadd.f32 %v2813_v35, %v931_v56  ;;  %v1032_v35 = vadd.f32 %v2839_v62, %v2826_v63 }
 0x131   :  { %1387 = vmatmul.bf16.vlgmr.msra.gmra.mxu2 %v1239_v14  ;;  %v989_v26 = vadd.f32 %v2815_v38, %v960_v59  ;;  %v1061_v38 = vadd.f32 %v2830_v15, %v1032_v35 }
 0x132   :  { %v1005_v50 = vpop.f32.mrf.mxu2 }
 0x133   :  { %v1006_v42 = vadd.f32 %v1005_v50, %v2785_v61  ;;  %v1090_v31 = vadd.f32 %v2833_v54, %v1061_v38 }
 0x135   :  { %v1034_v4 = vpop.f32.mrf.mxu3  ;;  %v2845_v19 = vpop.f32.mrf.mxu0  ;;  %v1227_v60 = vmax.f32 %v1006_v42, 0.0 }
 0x136   :  { %v1035_v48 = vadd.f32 %v1034_v4, %v2826_v63 }
 0x137   :  { %v2848_v3 = vpop.f32.mrf.mxu1 }
 0x138   :  { %v1064_v8 = vadd.f32 %v1063_v1, %v1035_v48 }
 0x13a   :  { %v2850_v58 = vadd.f32 %v1092_v23, %v1064_v8  ;;  %v1007_v43 = vpop.f32.mrf.mxu2 }
 0x13b   :  { %v1008_v29 = vadd.f32 %v1007_v43, %v979_v12 }
 0x13d   :  { %v2854_v16 = vpop.f32.mrf.mxu3  ;;  %v1068_v30 = vpop.f32.mrf.mxu0  ;;  %v1229_v32 = vmax.f32 %v1008_v29, 0.0 }
 0x13f   :  { %v1097_v33 = vpop.f32.mrf.mxu1  ;;  %v1241_v36 = vpack.c.bf16 %v1229_v32, %v1227_v60 }
 0x141   :  { %1392 = vmatmul.bf16.gmra.mxu2 %v1241_v36 }
 0x142   :  { %v1010_v61 = vpop.f32.mrf.mxu2 }
 0x143   :  { %v1011_v24 = vadd.f32 %v1010_v61, %v2801_v41 }
 0x145   :  { %v1039_v44 = vpop.f32.mrf.mxu3  ;;  %v2860_v5 = vpop.f32.mrf.mxu0  ;;  %v1231_v39 = vmax.f32 %v1011_v24, 0.0 }
 0x146   :  { %v1040_v2 = vadd.f32 %v1039_v44, %v2826_v63 }
 0x147   :  { %v2863_v25 = vpop.f32.mrf.mxu1 }
 0x148   :  { %v1069_v6 = vadd.f32 %v1068_v30, %v1040_v2 }
 0x14a   :  { %v2865_v22 = vadd.f32 %v1097_v33, %v1069_v6  ;;  %v1012_v51 = vpop.f32.mrf.mxu2 }
 0x14b   :  { %v1013_v57 = vadd.f32 %v1012_v51, %v984_v46 }
 0x14d   :  { %v2869_v49 = vpop.f32.mrf.mxu3  ;;  %v1073_v53 = vpop.f32.mrf.mxu0  ;;  %v1233_v21 = vmax.f32 %v1013_v57, 0.0 }
 0x14f   :  { %v1102_v13 = vpop.f32.mrf.mxu1  ;;  %v1243_v55 = vpack.c.bf16 %v1233_v21, %v1231_v39 }
 0x151   :  { %1397 = vmatmul.bf16.gmra.mxu2 %v1243_v55 }
 0x152   :  { %v1015_v41 = vpop.f32.mrf.mxu2 }
 0x153   :  { %v1016_v14 = vadd.f32 %v1015_v41, %v2817_v27 }
 0x155   :  { %v1044_v1 = vpop.f32.mrf.mxu3  ;;  %v2875_v47 = vpop.f32.mrf.mxu0  ;;  %v1235_v48 = vmax.f32 %v1016_v14, 0.0 }
 0x156   :  { %v1045_v11 = vadd.f32 %v1044_v1, %v2826_v63 }
 0x157   :  { %v2878_v45 = vpop.f32.mrf.mxu1 }
 0x158   :  { %v1074_v23 = vadd.f32 %v1073_v53, %v1045_v11 }
 0x15a   :  { %v2880_v28 = vadd.f32 %v1102_v13, %v1074_v23  ;;  %v1017_v17 = vpop.f32.mrf.mxu2 }
 0x15b   :  { %v1018_v10 = vadd.f32 %v1017_v17, %v989_v26 }
 0x15d   :  { %v2884_v50 = vpop.f32.mrf.mxu3  ;;  %v1174_v4 = vpop.f32.mrf.mxu0  ;;  %v1237_v20 = vmax.f32 %v1018_v10, 0.0 }
 0x15f   :  { %v1203_v8 = vpop.f32.mrf.mxu1  ;;  %v1245_v37 = vpack.c.bf16 %v1237_v20, %v1235_v48 }
 0x161   :  { %1402 = vmatmul.bf16.gmra.mxu2 %v1245_v37 }
 0x162   :  { %v1116_v42 = vpop.f32.mrf.mxu2 }
 0x163   :  { %v1117_v12 = vadd.f32 %v1116_v42, %v2835_v52  ;;  %v1037_v52 = vadd.f32 %v2854_v16, %v2826_v63 }
 0x165   :  { %v1145_v43 = vpop.f32.mrf.mxu3  ;;  %v1176_v27 = vpop.f32.mrf.mxu0  ;;  %v1066_v54 = vadd.f32 %v2845_v19, %v1037_v52 }
 0x166   :  { %v1146_v30 = vadd.f32 %v1145_v43, %v1117_v12 }
 0x167   :  { %v1205_v29 = vpop.f32.mrf.mxu1  ;;  %v1095_v18 = vadd.f32 %v2848_v3, %v1066_v54  ;;  %v2332_v54 = vld [vmem:[#allocation10 + $0x28] sm:$0xff] }
 0x168   :  { %v1175_v32 = vadd.f32 %v1174_v4, %v1146_v30 }
 0x16a   :  { %v1118_v60 = vpop.f32.mrf.mxu2  ;;  %v1204_v62 = vadd.f32 %v1203_v8, %v1175_v32 }
 0x16b   :  { %v1119_v33 = vadd.f32 %v1118_v60, %v1090_v31 }
 0x16c   :  { %v1224_v6 = vmax.f32 %v1204_v62, 0.0 }
 0x16d   :  { %v1147_v36 = vpop.f32.mrf.mxu3  ;;  %v1179_v9 = vpop.f32.mrf.mxu0 }
 0x16e   :  { %v1148_v0 = vadd.f32 %v1147_v36, %v1119_v33 }
 0x16f   :  { %v1208_v61 = vpop.f32.mrf.mxu1 }
 0x170   :  { %v1177_v44 = vadd.f32 %v1176_v27, %v1148_v0 }
 0x172   :  { %v1206_v2 = vadd.f32 %v1205_v29, %v1177_v44  ;;  %v1121_v34 = vpop.f32.mrf.mxu2 }
 0x173   :  { %v1122_v24 = vadd.f32 %v1121_v34, %v2850_v58  ;;  %v1042_v58 = vadd.f32 %v2869_v49, %v2826_v63 }
 0x174   :  { %v1226_v15 = vmax.f32 %v1206_v2, 0.0 }
 0x175   :  { %v1150_v46 = vpop.f32.mrf.mxu3  ;;  %v1181_v57 = vpop.f32.mrf.mxu0  ;;  %v1071_v3 = vadd.f32 %v2860_v5, %v1042_v58 }
 0x176   :  { %v1240_v51 = vpack.c.bf16 %v1226_v15, %v1224_v6  ;;  %v1151_v7 = vadd.f32 %v1150_v46, %v1122_v24  ;;  %v2333_v46 = vld [vmem:[#allocation10 + $0x30] sm:$0xff] }
 0x177   :  { %v1210_v53 = vpop.f32.mrf.mxu1  ;;  %v1100_v4 = vadd.f32 %v2863_v25, %v1071_v3 }
 0x178   :  { %1416 = vmatmul.bf16.vlgmr.msra.gmra.mxu3 %v1240_v51  ;;  %v1180_v21 = vadd.f32 %v1179_v9, %v1151_v7  ;;  %v2330_v51 = vld [vmem:[#allocation10 + $0x18] sm:$0xff]  ;;  %v2328_v7 = vld [vmem:[#allocation10 + $0x8] sm:$0xff] }
 0x17a   :  { %v1123_v39 = vpop.f32.mrf.mxu2  ;;  %v1209_v56 = vadd.f32 %v1208_v61, %v1180_v21 }
 0x17b   :  { %v1124_v13 = vadd.f32 %v1123_v39, %v1095_v18 }
 0x17c   :  { %v1228_v59 = vmax.f32 %v1209_v56, 0.0 }
 0x17d   :  { %v1152_v16 = vpop.f32.mrf.mxu3  ;;  %v1184_v1 = vpop.f32.mrf.mxu0 }
 0x17e   :  { %v1153_v55 = vadd.f32 %v1152_v16, %v1124_v13  ;;  %v2372_v13 = vld [vmem:[%s2925_s4] ss:$0 sm:$0xff] }
 0x17f   :  { %v1213_v19 = vpop.f32.mrf.mxu1 }
 0x180   :  { %v1182_v41 = vadd.f32 %v1181_v57, %v1153_v55  ;;  %v2329_v57 = vld [vmem:[#allocation10 + $0x10] sm:$0xff] }
 0x182   :  { %v1211_v40 = vadd.f32 %v1210_v53, %v1182_v41  ;;  %v1126_v11 = vpop.f32.mrf.mxu2  ;;  %v2327_v53 = vld [vmem:[#allocation10] sm:$0xff] }
 0x183   :  { %v1127_v14 = vadd.f32 %v1126_v11, %v2865_v22  ;;  %v1047_v22 = vadd.f32 %v2884_v50, %v2826_v63 }
 0x184   :  { %v1230_v23 = vmax.f32 %v1211_v40, 0.0 }
 0x185   :  { %v1155_v26 = vpop.f32.mrf.mxu3  ;;  %v1186_v48 = vpop.f32.mrf.mxu0  ;;  %v1076_v60 = vadd.f32 %v2875_v47, %v1047_v22  ;;  %v2334_v47 = vld [vmem:[#allocation10 + $0x38] sm:$0xff] }
 0x186   :  { %v1242_v17 = vpack.c.bf16 %v1230_v23, %v1228_v59  ;;  %v1156_v10 = vadd.f32 %v1155_v26, %v1127_v14  ;;  %1517 = vmatpush.bf16.msra.mxu0 %v2334_v47 }
 0x187   :  { %v1215_v35 = vpop.f32.mrf.mxu1  ;;  %v1105_v9 = vadd.f32 %v2878_v45, %v1076_v60  ;;  %v2331_v45 = vld [vmem:[#allocation10 + $0x20] sm:$0xff] }
 0x188   :  { %1421 = vmatmul.bf16.gmra.mxu3 %v1242_v17  ;;  %v1185_v8 = vadd.f32 %v1184_v1, %v1156_v10 }
 0x18a   :  { %v1128_v20 = vpop.f32.mrf.mxu2  ;;  %v1214_v12 = vadd.f32 %v1213_v19, %v1185_v8  ;;  %1518 = vmatpush.bf16.msra.mxu0 %v2333_v46 }
 0x18b   :  { %v1129_v37 = vadd.f32 %v1128_v20, %v1100_v4 }
 0x18c   :  { %v1232_v5 = vmax.f32 %v1214_v12, 0.0 }
 0x18d   :  { %v1157_v49 = vpop.f32.mrf.mxu3  ;;  %v1189_v25 = vpop.f32.mrf.mxu0 }
 0x18e   :  { %v1158_v42 = vadd.f32 %v1157_v49, %v1129_v37  ;;  %1519 = vmatpush.bf16.msra.mxu0 %v2332_v54  ;;  %v2342_v37 = vld [vmem:[#allocation11 + $0x38] sm:$0xff] }
 0x18f   :  { %v1218_v33 = vpop.f32.mrf.mxu1  ;;  %1626 = vmatpush.bf16.msra.mxu1 %v2342_v37 }
 0x190   :  { %v1187_v43 = vadd.f32 %v1186_v48, %v1158_v42  ;;  %v2341_v42 = vld [vmem:[#allocation11 + $0x30] sm:$0xff] }
 0x192   :  { %v1216_v27 = vadd.f32 %v1215_v35, %v1187_v43  ;;  %v1131_v38 = vpop.f32.mrf.mxu2  ;;  %1520 = vmatpush.bf16.msra.mxu0 %v2331_v45  ;;  %v2340_v43 = vld [vmem:[#allocation11 + $0x28] sm:$0xff] }
 0x193   :  { %v1132_v30 = vadd.f32 %v1131_v38, %v2880_v28  ;;  %1627 = vmatpush.bf16.msra.mxu1 %v2341_v42 }
 0x194   :  { %v1234_v29 = vmax.f32 %v1216_v27, 0.0 }
 0x195   :  { %v1160_v31 = vpop.f32.mrf.mxu3  ;;  %v1191_v44 = vpop.f32.mrf.mxu0 }
 0x196   :  { %v1244_v32 = vpack.c.bf16 %v1234_v29, %v1232_v5  ;;  %v1161_v36 = vadd.f32 %v1160_v31, %v1132_v30  ;;  %1521 = vmatpush.bf16.msra.mxu0 %v2330_v51  ;;  %v2339_v29 = vld [vmem:[#allocation11 + $0x20] sm:$0xff] }
 0x197   :  { %v1220_v34 = vpop.f32.mrf.mxu1  ;;  %1628 = vmatpush.bf16.msra.mxu1 %v2340_v43 }
 0x198   :  { %1426 = vmatmul.bf16.gmra.mxu3 %v1244_v32  ;;  %v1190_v61 = vadd.f32 %v1189_v25, %v1161_v36  ;;  %v2338_v32 = vld [vmem:[#allocation11 + $0x18] sm:$0xff]  ;;  %v2337_v36 = vld [vmem:[#allocation11 + $0x10] sm:$0xff] }
 0x19a   :  { %v1133_v0 = vpop.f32.mrf.mxu2  ;;  %v1219_v52 = vadd.f32 %v1218_v33, %v1190_v61  ;;  %1522 = vmatpush.bf16.msra.mxu0 %v2329_v57  ;;  %v2336_v61 = vld [vmem:[#allocation11 + $0x8] sm:$0xff] }
 0x19b   :  { %v1134_v62 = vadd.f32 %v1133_v0, %v1105_v9  ;;  %1629 = vmatpush.bf16.msra.mxu1 %v2339_v29 }
 0x19c   :  { %v1236_v6 = vmax.f32 %v1219_v52, 0.0 }
 0x19d   :  { %v1162_v63 = vpop.f32.mrf.mxu3 }
 0x19e   :  { %v1163_v50 = vadd.f32 %v1162_v63, %v1134_v62  ;;  %1523 = vmatpush.bf16.msra.mxu0 %v2328_v7 }
 0x19f   :  { %1630 = vmatpush.bf16.msra.mxu1 %v2338_v32 }
 0x1a0   :  { %v1192_v2 = vadd.f32 %v1191_v44, %v1163_v50 }
 0x1a2   :  { %v1221_v28 = vadd.f32 %v1220_v34, %v1192_v2  ;;  %1524 = vmatpush.bf16.msra.mxu0 %v2327_v53 }
 0x1a3   :  { %1631 = vmatpush.bf16.msra.mxu1 %v2337_v36 }
 0x1a4   :  { %v1238_v15 = vmax.f32 %v1221_v28, 0.0  ;;  %v2335_v28 = vld [vmem:[#allocation11] sm:$0xff] }
 0x1a6   :  { %v1246_v24 = vpack.c.bf16 %v1238_v15, %v1236_v6  ;;  %v2373_v15 = vld [vmem:[%s2927_s6] ss:$0 sm:$0xff] }
 0x1a7   :  { %1632 = vmatpush.bf16.msra.mxu1 %v2336_v61 }
 0x1a8   :  { %1431 = vmatmul.bf16.gmra.mxu3 %v1246_v24 }
 0x1ab   :  { %1633 = vmatpush.bf16.msra.mxu1 %v2335_v28 }
 0x1b4   :  { %v1388_v18 = vpop.f32.mrf.mxu2 }
 0x1b5   :  { %v1389_v55 = vadd.f32 %v2372_v13, %v1388_v18 }
 0x1bc   :  { %v1390_v39 = vpop.f32.mrf.mxu2 }
 0x1bd   :  { %v1391_v56 = vadd.f32 %v2372_v13, %v1390_v39 }
 0x1c4   :  { %v1393_v16 = vpop.f32.mrf.mxu2 }
 0x1c5   :  { %v1394_v14 = vadd.f32 %v2372_v13, %v1393_v16 }
 0x1cc   :  { %v1395_v11 = vpop.f32.mrf.mxu2 }
 0x1cd   :  { %v1396_v3 = vadd.f32 %v2372_v13, %v1395_v11 }
 0x1d4   :  { %v1398_v26 = vpop.f32.mrf.mxu2 }
 0x1d5   :  { %v1399_v12 = vadd.f32 %v2372_v13, %v1398_v26 }
 0x1dc   :  { %v1400_v49 = vpop.f32.mrf.mxu2 }
 0x1dd   :  { %v1401_v22 = vadd.f32 %v2372_v13, %v1400_v49 }
 0x1e4   :  { %v1403_v30 = vpop.f32.mrf.mxu2 }
 0x1e5   :  { %v1404_v0 = vadd.f32 %v2372_v13, %v1403_v30 }
 0x1ec   :  { %v1405_v9 = vpop.f32.mrf.mxu2 }
 0x1ed   :  { %v1406_v62 = vadd.f32 %v2372_v13, %v1405_v9 }
 0x1fb   :  { %v1417_v21 = vpop.f32.mrf.mxu3 }
 0x1fc   :  { %v1418_v41 = vadd.f32 %v1417_v21, %v1389_v55 }
 0x1fe   :  { %v1437_v40 = vmax.f32 %v1418_v41, 0.0 }
 0x203   :  { %v1419_v1 = vpop.f32.mrf.mxu3 }
 0x204   :  { %v1420_v58 = vadd.f32 %v1419_v1, %v1391_v56 }
 0x206   :  { %v1438_v19 = vmax.f32 %v1420_v58, 0.0 }
 0x208   :  { %v1445_v59 = vpack.c.bf16 %v1438_v19, %v1437_v40 }
 0x20a   :  { %1525 = vmatmul.bf16.vlgmr.msra.gmra.mxu0 %v1445_v59 }
 0x20b   :  { %v1422_v23 = vpop.f32.mrf.mxu3 }
 0x20c   :  { %v1423_v17 = vadd.f32 %v1422_v23, %v1394_v14 }
 0x20e   :  { %v1439_v48 = vmax.f32 %v1423_v17, 0.0  ;;  %v2374_v17 = vld [vmem:[%s2929_s8] ss:$0 sm:$0xff]  ;;  %s2565_s8 = smov [#allocation13]  }
 0x20f   :  { %s1667_s23 = sshll.u32 %s2565_s8, 4  ;;  %s1668_s23 = int_to_ptr.vmem [resolvable:$true] %s1667_s23 }
 0x213   :  { %v1424_v10 = vpop.f32.mrf.mxu3 }
 0x214   :  { %v1425_v4 = vadd.f32 %v1424_v10, %v1396_v3 }
 0x216   :  { %v1440_v20 = vmax.f32 %v1425_v4, 0.0 }
 0x218   :  { %v1446_v8 = vpack.c.bf16 %v1440_v20, %v1439_v48 }
 0x21a   :  { %1530 = vmatmul.bf16.gmra.mxu0 %v1446_v8 }
 0x21b   :  { %v1427_v35 = vpop.f32.mrf.mxu3 }
 0x21c   :  { %v1428_v27 = vadd.f32 %v1427_v35, %v1399_v12 }
 0x21e   :  { %v1441_v31 = vmax.f32 %v1428_v27, 0.0 }
 0x223   :  { %v1429_v38 = vpop.f32.mrf.mxu3 }
 0x224   :  { %v1430_v5 = vadd.f32 %v1429_v38, %v1401_v22 }
 0x226   :  { %v1442_v25 = vmax.f32 %v1430_v5, 0.0 }
 0x228   :  { %v1447_v60 = vpack.c.bf16 %v1442_v25, %v1441_v31 }
 0x22a   :  { %1535 = vmatmul.bf16.gmra.mxu0 %v1447_v60 }
 0x22b   :  { %v1432_v33 = vpop.f32.mrf.mxu3 }
 0x22c   :  { %v1433_v63 = vadd.f32 %v1432_v33, %v1404_v0 }
 0x22e   :  { %v1443_v52 = vmax.f32 %v1433_v63, 0.0 }
 0x233   :  { %v1434_v50 = vpop.f32.mrf.mxu3 }
 0x234   :  { %v1435_v44 = vadd.f32 %v1434_v50, %v1406_v62 }
 0x236   :  { %v1444_v2 = vmax.f32 %v1435_v44, 0.0 }
 0x238   :  { %v1448_v34 = vpack.c.bf16 %v1444_v2, %v1443_v52 }
 0x23a   :  { %1540 = vmatmul.bf16.gmra.mxu0 %v1448_v34 }
 0x287   :  { %v1526_v6 = vpop.f32.mrf.mxu0 }
 0x288   :  { %v1527_v24 = vadd.f32 %v2373_v15, %v1526_v6 }
 0x28a   :  { %v1546_v54 = vmax.f32 %v1527_v24, 0.0 }
 0x28f   :  { %v1528_v47 = vpop.f32.mrf.mxu0 }
 0x290   :  { %v1529_v46 = vadd.f32 %v2373_v15, %v1528_v47 }
 0x292   :  { %v1547_v45 = vmax.f32 %v1529_v46, 0.0 }
 0x294   :  { %v1554_v51 = vpack.c.bf16 %v1547_v45, %v1546_v54 }
 0x296   :  { %1634 = vmatmul.bf16.vlgmr.msra.gmra.mxu1 %v1554_v51 }
 0x297   :  { %v1531_v57 = vpop.f32.mrf.mxu0 }
 0x298   :  { %v1532_v7 = vadd.f32 %v2373_v15, %v1531_v57 }
 0x29a   :  { %v1548_v39 = vmax.f32 %v1532_v7, 0.0 }
 0x29f   :  { %v1533_v53 = vpop.f32.mrf.mxu0 }
 0x2a0   :  { %v1534_v18 = vadd.f32 %v2373_v15, %v1533_v53 }
 0x2a2   :  { %v1549_v21 = vmax.f32 %v1534_v18, 0.0 }
 0x2a4   :  { %v1555_v13 = vpack.c.bf16 %v1549_v21, %v1548_v39 }
 0x2a6   :  { %1639 = vmatmul.bf16.gmra.mxu1 %v1555_v13 }
 0x2a7   :  { %v1536_v16 = vpop.f32.mrf.mxu0 }
 0x2a8   :  { %v1537_v55 = vadd.f32 %v2373_v15, %v1536_v16 }
 0x2aa   :  { %v1550_v1 = vmax.f32 %v1537_v55, 0.0 }
 0x2af   :  { %v1538_v56 = vpop.f32.mrf.mxu0 }
 0x2b0   :  { %v1539_v41 = vadd.f32 %v2373_v15, %v1538_v56 }
 0x2b2   :  { %v1551_v58 = vmax.f32 %v1539_v41, 0.0 }
 0x2b4   :  { %v1556_v40 = vpack.c.bf16 %v1551_v58, %v1550_v1 }
 0x2b6   :  { %1644 = vmatmul.bf16.gmra.mxu1 %v1556_v40 }
 0x2b7   :  { %v1541_v19 = vpop.f32.mrf.mxu0 }
 0x2b8   :  { %v1542_v11 = vadd.f32 %v2373_v15, %v1541_v19 }
 0x2ba   :  { %v1552_v14 = vmax.f32 %v1542_v11, 0.0 }
 0x2bf   :  { %v1543_v59 = vpop.f32.mrf.mxu0 }
 0x2c0   :  { %v1544_v23 = vadd.f32 %v2373_v15, %v1543_v59 }
 0x2c2   :  { %v1553_v26 = vmax.f32 %v1544_v23, 0.0 }
 0x2c4   :  { %v1557_v3 = vpack.c.bf16 %v1553_v26, %v1552_v14 }
 0x2c6   :  { %1649 = vmatmul.bf16.gmra.mxu1 %v1557_v3 }
 0x313   :  { %v1635_v10 = vpop.f32.mrf.mxu1 }
 0x314   :  { %v1636_v4 = vadd.f32 %v2374_v17, %v1635_v10 }
 0x316   :  { %1655 = vst [vmem:[#allocation13] sm:$0xff] %v1636_v4 }
 0x31b   :  { %v1637_v48 = vpop.f32.mrf.mxu1 }
 0x31c   :  { %v1638_v20 = vadd.f32 %v2374_v17, %v1637_v48 }
 0x31e   :  { %1656 = vst [vmem:[#allocation13 + $0x8] sm:$0xff] %v1638_v20 }
 0x323   :  { %v1640_v8 = vpop.f32.mrf.mxu1 }
 0x324   :  { %v1641_v37 = vadd.f32 %v2374_v17, %v1640_v8 }
 0x326   :  { %1657 = vst [vmem:[#allocation13 + $0x10] sm:$0xff] %v1641_v37 }
 0x32b   :  { %v1642_v49 = vpop.f32.mrf.mxu1 }
 0x32c   :  { %v1643_v35 = vadd.f32 %v2374_v17, %v1642_v49 }
 0x32e   :  { %1658 = vst [vmem:[#allocation13 + $0x18] sm:$0xff] %v1643_v35 }
 0x333   :  { %v1645_v42 = vpop.f32.mrf.mxu1 }
 0x334   :  { %v1646_v12 = vadd.f32 %v2374_v17, %v1645_v42 }
 0x336   :  { %1659 = vst [vmem:[#allocation13 + $0x20] sm:$0xff] %v1646_v12 }
 0x33b   :  { %v1647_v43 = vpop.f32.mrf.mxu1 }
 0x33c   :  { %v1648_v22 = vadd.f32 %v2374_v17, %v1647_v43 }
 0x33e   :  { %1660 = vst [vmem:[#allocation13 + $0x28] sm:$0xff] %v1648_v22 }
 0x343   :  { %v1650_v27 = vpop.f32.mrf.mxu1 }
 0x344   :  { %v1651_v38 = vadd.f32 %v2374_v17, %v1650_v27 }
 0x346   :  { %1661 = vst [vmem:[#allocation13 + $0x30] sm:$0xff] %v1651_v38 }
 0x34b   :  { %v1652_v5 = vpop.f32.mrf.mxu1 }
 0x34c   :  { %v1653_v29 = vadd.f32 %v2374_v17, %v1652_v5 }
 0x34e   :  { %1662 = vst [vmem:[#allocation13 + $0x38] sm:$0xff] %v1653_v29 }
 0x34f   :  { %1675 = dma.vmem_to_hbm [thread:$0]  %s1668_s23, 1024, %s1670_s25, [#allocation4], %s2554_s17, %s2554_s17, %s2555_s18  }
 0x350   :  { %2551 = dma.done.wait [#allocation4], 1024  }
 0x351   :  { %2552 = vsyncadd [#allocation4], 4294966272 }
 0x352   :  { %1680 = vsyncpa [#allocation3], 1 }
 0x353   :  { %1681 = vsyncpa [#allocation6], 1 }
 0x354   :  { %1682 = vsyncpa [#allocation9], 1 }
 0x355   :  { %1683 = vsyncpa [#allocation12], 1 }
 0x356   :  { %1684 = vsyncpa [#allocation4], 1 }

</bundles_post_ra>
